<compile_context>
chip_gen: v5e
topology: v5e:2x2
jax: 0.10.0
libtpu: 0.0.40
codegen_flags: <defaults>
</compile_context>

<pallas_src>
import functools

import jax
import jax.numpy as jnp
from jax import lax
from jax.experimental import pallas as pl
from jax.experimental.pallas import tpu as pltpu  # noqa: F401  (kept for clarity)

# ----------------------------- problem sizes -----------------------------
B, C, H, W = 2, 4, 16, 16      # batch of text instances, NCHW input image crops
HW = H * W                     # flattened spatial positions
T = 8                          # max decode length (pt_lengths upper bound)
D = 32                         # hidden width of vision/language features
NC = 32                        # charset size, index 0 == null / end token
ITER_SIZE = 3                  # cfg.MODEL.ABINET.ITER_SIZE
MODEL_EVAL = 'alignment'       # cfg.MODEL.ABINET.MODEL_EVAL
SCALE = 1.0 / (D ** 0.5)
BT = B * T
NEG_INF = -1e30


# --------------------------- in-kernel helpers ---------------------------
def _softmax_lanes(x):
    """Softmax over the lane (last) axis; reciprocal goes to the EUP slot."""
    m = jnp.max(x, axis=-1, keepdims=True)
    e = jnp.exp(x - m)
    s = jnp.sum(e, axis=-1, keepdims=True)
    return e * pl.reciprocal(s, approx=True)


def _length_from_logits(lg):
    """ABINet _get_length: 1 + index of first null (class 0) pred, else T.

    lg: (T, NC).  Returns (1, 1) int32 (kept 2-D to stay vector-friendly).
    argmax(row)==0  <=>  lg[:, 0] == row max (argmax returns first max index).
    """
    row_max = jnp.max(lg, axis=-1, keepdims=True)               # (T, 1)
    is_null = lg[:, 0:1] >= row_max                             # (T, 1)
    pos = lax.broadcasted_iota(jnp.int32, (T, 1), 0)            # (T, 1)
    cand = jnp.where(is_null, pos, jnp.int32(T))
    first = jnp.min(cand, axis=0, keepdims=True)                # (1, 1)
    return jnp.where(first < T, first + 1, jnp.int32(T))        # (1, 1)


# ------------------------------ fused kernel ------------------------------
def abinet_fused_kernel(
    x_ref,                      # (C, B*HW)  channels on sublanes, B*HW on lanes
    v_wbbT_ref, v_bbbT_ref,     # (D, C), (D, 1)
    v_wkvT_ref,                 # (2D, D) = [wk.T ; wv.T]  (fused k|v projection)
    v_posq_ref,                 # (T, D) positional queries
    v_wcls_ref, v_bcls_ref,     # (D, NC), (1, NC)
    l_wproj_ref, l_pos_ref,     # (NC, D), (B*T, D)  (pos already tiled over B)
    l_wq_ref, l_wk_ref, l_wv_ref,   # (D, D) x 3
    l_wcls_ref, l_bcls_ref,     # (D, NC), (1, NC)
    a_wl_ref, a_wv_ref, a_b_ref,    # (D, D), (D, D), (1, D)
    a_wcls_ref, a_bcls_ref,     # (D, NC), (1, NC)
    v_logits_ref,               # out (B*T, NC)
    a_logits_ref,               # out (B*T, NC)
    attn_ref,                   # out (B*T, HW)   lane-dense (HW=256)
):
    f32 = jnp.float32

    # ----------------- vision: backbone + positional attention -----------------
    # hT[d, b*HW+p] = relu(sum_c wbb[c,d] * x[b, c, p] + bbb[d])
    hT = jnp.dot(v_wbbT_ref[...], x_ref[...], preferred_element_type=f32)
    hT = jnp.maximum(hT + v_bbbT_ref[...], 0.0)                      # (D, B*HW)
    kvT = jnp.dot(v_wkvT_ref[...], hT, preferred_element_type=f32)   # (2D, B*HW)

    q = v_posq_ref[...]                                              # (T, D)
    feats = []
    for b in range(B):                                               # B=2, unrolled
        kT_b = kvT[0:D, b * HW:(b + 1) * HW]                         # (D, HW)
        vT_b = kvT[D:2 * D, b * HW:(b + 1) * HW]                     # (D, HW)
        s = jnp.dot(q, kT_b, preferred_element_type=f32) * SCALE     # (T, HW)
        p = _softmax_lanes(s)
        attn_ref[b * T:(b + 1) * T, :] = p                           # unmasked 256-lane store
        # feat = p @ v : contract HW of p with HW of vT (no transpose needed)
        feats.append(lax.dot_general(p, vT_b, (((1,), (1,)), ((), ())),
                                     preferred_element_type=f32))    # (T, D)
    v_feat = jnp.concatenate(feats, axis=0)                          # (B*T, D)
    v_logits = (jnp.dot(v_feat, v_wcls_ref[...], preferred_element_type=f32)
                + v_bcls_ref[...])                                   # (B*T, NC)
    v_logits_ref[...] = v_logits

    # ------------- iterative language -> alignment refinement (in-kernel) -------------
    cur_logits = v_logits
    for _ in range(ITER_SIZE):                                       # unrolled x3
        # language: tokens = softmax(prev logits), embed, masked self-attention
        tok = _softmax_lanes(cur_logits)                             # (B*T, NC)
        emb = (jnp.dot(tok, l_wproj_ref[...], preferred_element_type=f32)
               + l_pos_ref[...])                                     # (B*T, D)
        ql = jnp.dot(emb, l_wq_ref[...], preferred_element_type=f32)
        kl = jnp.dot(emb, l_wk_ref[...], preferred_element_type=f32)
        vl = jnp.dot(emb, l_wv_ref[...], preferred_element_type=f32)

        lfeats = []
        for b in range(B):
            sl_ = slice(b * T, (b + 1) * T)                          # sublane-aligned (T=8)
            length = _length_from_logits(cur_logits[sl_, :])         # (1, 1)
            s = lax.dot_general(ql[sl_, :], kl[sl_, :],
                                (((1,), (1,)), ((), ())),
                                preferred_element_type=f32) * SCALE  # (T, T)
            kpos = lax.broadcasted_iota(jnp.int32, (T, T), 1)
            qpos = lax.broadcasted_iota(jnp.int32, (T, T), 0)
            # key-padding mask (keys beyond pt_length) + BCN location mask (no self-attend)
            valid = (kpos < length) & (kpos != qpos)
            p = _softmax_lanes(jnp.where(valid, s, NEG_INF))
            lfeats.append(jnp.dot(p, vl[sl_, :], preferred_element_type=f32))
        l_feat = jnp.concatenate(lfeats, axis=0)                     # (B*T, D)

        # alignment: gated fusion of language & vision features + classifier
        f = (jnp.dot(l_feat, a_wl_ref[...], preferred_element_type=f32)
             + jnp.dot(v_feat, a_wv_ref[...], preferred_element_type=f32)
             + a_b_ref[...])
        gate = jax.nn.sigmoid(f)
        fused = gate * v_feat + (1.0 - gate) * l_feat
        cur_logits = (jnp.dot(fused, a_wcls_ref[...], preferred_element_type=f32)
                      + a_bcls_ref[...])                             # (B*T, NC)

    a_logits_ref[...] = cur_logits


# ------------------------------ glue (JAX) ------------------------------
def get_lengths(logits):
    """ABINet _get_length: 1 + index of first null (class 0) prediction, else T."""
    ids = jnp.argmax(logits, axis=-1)                 # (B, T)
    is_null = ids == 0
    any_null = jnp.any(is_null, axis=-1)
    first = jnp.argmax(is_null, axis=-1).astype(jnp.int32) + 1
    return jnp.where(any_null, first, jnp.int32(T))


def abinet_iter_forward(x_nchw, params):
    # NCHW -> (C, B*HW): keep HW (256) and batch on the lane axis (lane-dense).
    x_t = jnp.transpose(x_nchw, (1, 0, 2, 3)).reshape(C, B * HW)

    # Host-side weight re-layouts (constant-folded under jit).
    v_wbbT = params['v_wbb'].T                                   # (D, C)
    v_bbbT = params['v_bbb'].reshape(D, 1)                       # (D, 1)
    v_wkvT = jnp.concatenate([params['v_wk'].T, params['v_wv'].T], axis=0)  # (2D, D)
    l_pos_bt = jnp.tile(params['l_pos'], (B, 1))                 # (B*T, D)

    v_logits_f, a_logits_f, attn_f = pl.pallas_call(
        abinet_fused_kernel,
        out_shape=(
            jax.ShapeDtypeStruct((BT, NC), jnp.float32),
            jax.ShapeDtypeStruct((BT, NC), jnp.float32),
            jax.ShapeDtypeStruct((BT, HW), jnp.float32),
        ),
        # no grid: single invocation, everything resident in VMEM
    )(x_t, v_wbbT, v_bbbT, v_wkvT, params['v_posq'], params['v_wcls'],
      params['v_bcls'], params['l_wproj'], l_pos_bt, params['l_wq'],
      params['l_wk'], params['l_wv'], params['l_wcls'], params['l_bcls'],
      params['a_wl'], params['a_wv'], params['a_b'], params['a_wcls'],
      params['a_bcls'])

    v_logits = v_logits_f.reshape(B, T, NC)
    a_logits = a_logits_f.reshape(B, T, NC)
    attn_scores = attn_f.reshape(B, T, HW)

    logits = v_logits if MODEL_EVAL == 'vision' else a_logits
    pt_lengths = get_lengths(logits)
    preds = jnp.argmax(logits, axis=-1)
    return {'recs': preds, 'logits': logits, 'pt_lengths': pt_lengths,
            'attn_scores': attn_scores}


# ------------------------------- main -------------------------------
if __name__ == "__main__":
    key = jax.random.PRNGKey(0)
    keys = jax.random.split(key, 16)

    def init(k, shape, fan_in):
        return jax.random.normal(k, shape, jnp.float32) / (fan_in ** 0.5)

    params = {
        # vision
        'v_wbb':  init(keys[0], (C, D), C),
        'v_bbb':  jnp.zeros((1, D), jnp.float32),
        'v_posq': init(keys[1], (T, D), D),
        'v_wk':   init(keys[2], (D, D), D),
        'v_wv':   init(keys[3], (D, D), D),
        'v_wcls': init(keys[4], (D, NC), D),
        'v_bcls': jnp.zeros((1, NC), jnp.float32),
        # language
        'l_wproj': init(keys[5], (NC, D), NC),
        'l_pos':   init(keys[6], (T, D), D),
        'l_wq':    init(keys[7], (D, D), D),
        'l_wk':    init(keys[8], (D, D), D),
        'l_wv':    init(keys[9], (D, D), D),
        'l_wcls':  init(keys[10], (D, NC), D),
        'l_bcls':  jnp.zeros((1, NC), jnp.float32),
        # alignment
        'a_wl':   init(keys[11], (D, D), 2 * D),
        'a_wv':   init(keys[12], (D, D), 2 * D),
        'a_b':    jnp.zeros((1, D), jnp.float32),
        'a_wcls': init(keys[13], (D, NC), D),
        'a_bcls': jnp.zeros((1, NC), jnp.float32),
    }

    x_nchw = jax.random.normal(keys[14], (B, C, H, W), jnp.float32)

    fwd = jax.jit(functools.partial(abinet_iter_forward, params=params))
    out = fwd(x_nchw)
    jax.block_until_ready(out)

    assert out['logits'].shape == (B, T, NC)
    assert out['recs'].shape == (B, T)
    assert out['pt_lengths'].shape == (B,)
    assert out['attn_scores'].shape == (B, T, HW)
    assert bool(jnp.all(jnp.isfinite(out['logits'])))
    print("KERNEL_OK")
</pallas_src>

<mosaic_0001>
module attributes {stable_mosaic.version = 11 : i64} {
  func.func @abinet_fused_kernel(%arg0: memref<4x512xf32, #tpu.memory_space<vmem>>, %arg1: memref<32x4xf32, #tpu.memory_space<vmem>>, %arg2: memref<32x1xf32, #tpu.memory_space<vmem>>, %arg3: memref<64x32xf32, #tpu.memory_space<vmem>>, %arg4: memref<8x32xf32, #tpu.memory_space<vmem>>, %arg5: memref<32x32xf32, #tpu.memory_space<vmem>>, %arg6: memref<1x32xf32, #tpu.memory_space<vmem>>, %arg7: memref<32x32xf32, #tpu.memory_space<vmem>>, %arg8: memref<16x32xf32, #tpu.memory_space<vmem>>, %arg9: memref<32x32xf32, #tpu.memory_space<vmem>>, %arg10: memref<32x32xf32, #tpu.memory_space<vmem>>, %arg11: memref<32x32xf32, #tpu.memory_space<vmem>>, %arg12: memref<32x32xf32, #tpu.memory_space<vmem>>, %arg13: memref<1x32xf32, #tpu.memory_space<vmem>>, %arg14: memref<32x32xf32, #tpu.memory_space<vmem>>, %arg15: memref<32x32xf32, #tpu.memory_space<vmem>>, %arg16: memref<1x32xf32, #tpu.memory_space<vmem>>, %arg17: memref<32x32xf32, #tpu.memory_space<vmem>>, %arg18: memref<1x32xf32, #tpu.memory_space<vmem>>, %arg19: memref<16x32xf32, #tpu.memory_space<vmem>>, %arg20: memref<16x32xf32, #tpu.memory_space<vmem>>, %arg21: memref<16x256xf32, #tpu.memory_space<vmem>>) attributes {dimension_semantics = [], scalar_prefetch = 0 : i64, scratch_operands = 0 : i64, tpu.core_type = #tpu.core_type<tc>} {
    %c0 = arith.constant 0 : index
    %c0_0 = arith.constant 0 : index
    %0 = vector.load %arg1[%c0, %c0_0] : memref<32x4xf32, #tpu.memory_space<vmem>>, vector<32x4xf32>
    %c0_1 = arith.constant 0 : index
    %c0_2 = arith.constant 0 : index
    %1 = vector.load %arg0[%c0_1, %c0_2] : memref<4x512xf32, #tpu.memory_space<vmem>>, vector<4x512xf32>
    %cst = arith.constant dense<0.000000e+00> : vector<32x512xf32>
    %2 = tpu.matmul %0, %1, %cst {dimension_numbers = #tpu.dot_dimension_numbers<[1], [0], [0], [1], [0, 0, 1, 1], [], []>} : vector<32x4xf32>, vector<4x512xf32>, vector<32x512xf32> -> vector<32x512xf32>
    %c0_3 = arith.constant 0 : index
    %c0_4 = arith.constant 0 : index
    %3 = vector.load %arg2[%c0_3, %c0_4] : memref<32x1xf32, #tpu.memory_space<vmem>>, vector<32x1xf32>
    %4 = vector.broadcast %3 : vector<32x1xf32> to vector<32x512xf32>
    %5 = arith.addf %2, %4 : vector<32x512xf32>
    %cst_5 = arith.constant 0.000000e+00 : f32
    %6 = vector.broadcast %cst_5 : f32 to vector<32x512xf32>
    %7 = arith.maximumf %5, %6 : vector<32x512xf32>
    %c0_6 = arith.constant 0 : index
    %c0_7 = arith.constant 0 : index
    %8 = vector.load %arg3[%c0_6, %c0_7] : memref<64x32xf32, #tpu.memory_space<vmem>>, vector<64x32xf32>
    %cst_8 = arith.constant dense<0.000000e+00> : vector<64x512xf32>
    %9 = tpu.matmul %8, %7, %cst_8 {dimension_numbers = #tpu.dot_dimension_numbers<[1], [0], [0], [1], [0, 0, 1, 1], [], []>} : vector<64x32xf32>, vector<32x512xf32>, vector<64x512xf32> -> vector<64x512xf32>
    %c0_9 = arith.constant 0 : index
    %c0_10 = arith.constant 0 : index
    %10 = vector.load %arg4[%c0_9, %c0_10] : memref<8x32xf32, #tpu.memory_space<vmem>>, vector<8x32xf32>
    %11 = vector.extract_strided_slice %9 {offsets = [0, 0], sizes = [32, 256], strides = [1, 1]} : vector<64x512xf32> to vector<32x256xf32>
    %12 = vector.extract_strided_slice %9 {offsets = [32, 0], sizes = [32, 256], strides = [1, 1]} : vector<64x512xf32> to vector<32x256xf32>
    %cst_11 = arith.constant dense<0.000000e+00> : vector<8x256xf32>
    %13 = tpu.matmul %10, %11, %cst_11 {dimension_numbers = #tpu.dot_dimension_numbers<[1], [0], [0], [1], [0, 0, 1, 1], [], []>} : vector<8x32xf32>, vector<32x256xf32>, vector<8x256xf32> -> vector<8x256xf32>
    %cst_12 = arith.constant 0.176776692 : f32
    %14 = vector.broadcast %cst_12 : f32 to vector<8x256xf32>
    %15 = arith.mulf %13, %14 : vector<8x256xf32>
    %cst_13 = arith.constant dense<0xFF800000> : vector<8xf32>
    %16 = vector.multi_reduction <maximumf>, %15, %cst_13 [1] : vector<8x256xf32> to vector<8xf32>
    %17 = vector.shape_cast %16 : vector<8xf32> to vector<8x1xf32>
    %18 = vector.broadcast %17 : vector<8x1xf32> to vector<8x256xf32>
    %19 = arith.subf %15, %18 : vector<8x256xf32>
    %20 = math.exp %19 : vector<8x256xf32>
    %cst_14 = arith.constant dense<0.000000e+00> : vector<8xf32>
    %21 = vector.multi_reduction <add>, %20, %cst_14 [1] : vector<8x256xf32> to vector<8xf32>
    %22 = vector.shape_cast %21 : vector<8xf32> to vector<8x1xf32>
    %23 = tpu.reciprocal %22 {approx = true} : vector<8x1xf32> -> vector<8x1xf32>
    %24 = vector.broadcast %23 : vector<8x1xf32> to vector<8x256xf32>
    %25 = arith.mulf %20, %24 : vector<8x256xf32>
    %c0_15 = arith.constant 0 : index
    %c0_16 = arith.constant 0 : index
    %26 = vector.load %arg21[%c0_15, %c0_16] : memref<16x256xf32, #tpu.memory_space<vmem>>, vector<8x256xf32>
    tpu.vector_store %arg21[%c0_15, %c0_16], %25 {strides = array<i32>} : memref<16x256xf32, #tpu.memory_space<vmem>>, vector<8x256xf32>,
    %cst_17 = arith.constant dense<0.000000e+00> : vector<8x32xf32>
    %27 = tpu.matmul %25, %12, %cst_17 {dimension_numbers = #tpu.dot_dimension_numbers<[1], [1], [0], [0], [0, 0, 1, 0], [], []>} : vector<8x256xf32>, vector<32x256xf32>, vector<8x32xf32> -> vector<8x32xf32>
    %28 = vector.extract_strided_slice %9 {offsets = [0, 256], sizes = [32, 256], strides = [1, 1]} : vector<64x512xf32> to vector<32x256xf32>
    %29 = vector.extract_strided_slice %9 {offsets = [32, 256], sizes = [32, 256], strides = [1, 1]} : vector<64x512xf32> to vector<32x256xf32>
    %cst_18 = arith.constant dense<0.000000e+00> : vector<8x256xf32>
    %30 = tpu.matmul %10, %28, %cst_18 {dimension_numbers = #tpu.dot_dimension_numbers<[1], [0], [0], [1], [0, 0, 1, 1], [], []>} : vector<8x32xf32>, vector<32x256xf32>, vector<8x256xf32> -> vector<8x256xf32>
    %cst_19 = arith.constant 0.176776692 : f32
    %31 = vector.broadcast %cst_19 : f32 to vector<8x256xf32>
    %32 = arith.mulf %30, %31 : vector<8x256xf32>
    %cst_20 = arith.constant dense<0xFF800000> : vector<8xf32>
    %33 = vector.multi_reduction <maximumf>, %32, %cst_20 [1] : vector<8x256xf32> to vector<8xf32>
    %34 = vector.shape_cast %33 : vector<8xf32> to vector<8x1xf32>
    %35 = vector.broadcast %34 : vector<8x1xf32> to vector<8x256xf32>
    %36 = arith.subf %32, %35 : vector<8x256xf32>
    %37 = math.exp %36 : vector<8x256xf32>
    %cst_21 = arith.constant dense<0.000000e+00> : vector<8xf32>
    %38 = vector.multi_reduction <add>, %37, %cst_21 [1] : vector<8x256xf32> to vector<8xf32>
    %39 = vector.shape_cast %38 : vector<8xf32> to vector<8x1xf32>
    %40 = tpu.reciprocal %39 {approx = true} : vector<8x1xf32> -> vector<8x1xf32>
    %41 = vector.broadcast %40 : vector<8x1xf32> to vector<8x256xf32>
    %42 = arith.mulf %37, %41 : vector<8x256xf32>
    %c8 = arith.constant 8 : index
    %c0_22 = arith.constant 0 : index
    %43 = vector.load %arg21[%c8, %c0_22] : memref<16x256xf32, #tpu.memory_space<vmem>>, vector<8x256xf32>
    tpu.vector_store %arg21[%c8, %c0_22], %42 {strides = array<i32>} : memref<16x256xf32, #tpu.memory_space<vmem>>, vector<8x256xf32>,
    %cst_23 = arith.constant dense<0.000000e+00> : vector<8x32xf32>
    %44 = tpu.matmul %42, %29, %cst_23 {dimension_numbers = #tpu.dot_dimension_numbers<[1], [1], [0], [0], [0, 0, 1, 0], [], []>} : vector<8x256xf32>, vector<32x256xf32>, vector<8x32xf32> -> vector<8x32xf32>
    %45 = tpu.concatenate %27, %44 in 0 : vector<8x32xf32>, vector<8x32xf32> -> vector<16x32xf32>
    %c0_24 = arith.constant 0 : index
    %c0_25 = arith.constant 0 : index
    %46 = vector.load %arg5[%c0_24, %c0_25] : memref<32x32xf32, #tpu.memory_space<vmem>>, vector<32x32xf32>
    %cst_26 = arith.constant dense<0.000000e+00> : vector<16x32xf32>
    %47 = tpu.matmul %45, %46, %cst_26 {dimension_numbers = #tpu.dot_dimension_numbers<[1], [0], [0], [1], [0, 0, 1, 1], [], []>} : vector<16x32xf32>, vector<32x32xf32>, vector<16x32xf32> -> vector<16x32xf32>
    %c0_27 = arith.constant 0 : index
    %c0_28 = arith.constant 0 : index
    %48 = vector.load %arg6[%c0_27, %c0_28] : memref<1x32xf32, #tpu.memory_space<vmem>>, vector<1x32xf32>
    %49 = vector.broadcast %48 : vector<1x32xf32> to vector<16x32xf32>
    %50 = arith.addf %47, %49 : vector<16x32xf32>
    %c0_29 = arith.constant 0 : index
    %c0_30 = arith.constant 0 : index
    %51 = vector.load %arg19[%c0_29, %c0_30] : memref<16x32xf32, #tpu.memory_space<vmem>>, vector<16x32xf32>
    tpu.vector_store %arg19[%c0_29, %c0_30], %50 {strides = array<i32>} : memref<16x32xf32, #tpu.memory_space<vmem>>, vector<16x32xf32>,
    %cst_31 = arith.constant dense<0xFF800000> : vector<16xf32>
    %52 = vector.multi_reduction <maximumf>, %50, %cst_31 [1] : vector<16x32xf32> to vector<16xf32>
    %53 = vector.shape_cast %52 : vector<16xf32> to vector<16x1xf32>
    %54 = vector.broadcast %53 : vector<16x1xf32> to vector<16x32xf32>
    %55 = arith.subf %50, %54 : vector<16x32xf32>
    %56 = math.exp %55 : vector<16x32xf32>
    %cst_32 = arith.constant dense<0.000000e+00> : vector<16xf32>
    %57 = vector.multi_reduction <add>, %56, %cst_32 [1] : vector<16x32xf32> to vector<16xf32>
    %58 = vector.shape_cast %57 : vector<16xf32> to vector<16x1xf32>
    %59 = tpu.reciprocal %58 {approx = true} : vector<16x1xf32> -> vector<16x1xf32>
    %60 = vector.broadcast %59 : vector<16x1xf32> to vector<16x32xf32>
    %61 = arith.mulf %56, %60 : vector<16x32xf32>
    %c0_33 = arith.constant 0 : index
    %c0_34 = arith.constant 0 : index
    %62 = vector.load %arg7[%c0_33, %c0_34] : memref<32x32xf32, #tpu.memory_space<vmem>>, vector<32x32xf32>
    %cst_35 = arith.constant dense<0.000000e+00> : vector<16x32xf32>
    %63 = tpu.matmul %61, %62, %cst_35 {dimension_numbers = #tpu.dot_dimension_numbers<[1], [0], [0], [1], [0, 0, 1, 1], [], []>} : vector<16x32xf32>, vector<32x32xf32>, vector<16x32xf32> -> vector<16x32xf32>
    %c0_36 = arith.constant 0 : index
    %c0_37 = arith.constant 0 : index
    %64 = vector.load %arg8[%c0_36, %c0_37] : memref<16x32xf32, #tpu.memory_space<vmem>>, vector<16x32xf32>
    %65 = arith.addf %63, %64 : vector<16x32xf32>
    %c0_38 = arith.constant 0 : index
    %c0_39 = arith.constant 0 : index
    %66 = vector.load %arg9[%c0_38, %c0_39] : memref<32x32xf32, #tpu.memory_space<vmem>>, vector<32x32xf32>
    %cst_40 = arith.constant dense<0.000000e+00> : vector<16x32xf32>
    %67 = tpu.matmul %65, %66, %cst_40 {dimension_numbers = #tpu.dot_dimension_numbers<[1], [0], [0], [1], [0, 0, 1, 1], [], []>} : vector<16x32xf32>, vector<32x32xf32>, vector<16x32xf32> -> vector<16x32xf32>
    %c0_41 = arith.constant 0 : index
    %c0_42 = arith.constant 0 : index
    %68 = vector.load %arg10[%c0_41, %c0_42] : memref<32x32xf32, #tpu.memory_space<vmem>>, vector<32x32xf32>
    %cst_43 = arith.constant dense<0.000000e+00> : vector<16x32xf32>
    %69 = tpu.matmul %65, %68, %cst_43 {dimension_numbers = #tpu.dot_dimension_numbers<[1], [0], [0], [1], [0, 0, 1, 1], [], []>} : vector<16x32xf32>, vector<32x32xf32>, vector<16x32xf32> -> vector<16x32xf32>
    %c0_44 = arith.constant 0 : index
    %c0_45 = arith.constant 0 : index
    %70 = vector.load %arg11[%c0_44, %c0_45] : memref<32x32xf32, #tpu.memory_space<vmem>>, vector<32x32xf32>
    %cst_46 = arith.constant dense<0.000000e+00> : vector<16x32xf32>
    %71 = tpu.matmul %65, %70, %cst_46 {dimension_numbers = #tpu.dot_dimension_numbers<[1], [0], [0], [1], [0, 0, 1, 1], [], []>} : vector<16x32xf32>, vector<32x32xf32>, vector<16x32xf32> -> vector<16x32xf32>
    %72 = vector.extract_strided_slice %50 {offsets = [0, 0], sizes = [8, 32], strides = [1, 1]} : vector<16x32xf32> to vector<8x32xf32>
    %cst_47 = arith.constant dense<0xFF800000> : vector<8xf32>
    %73 = vector.multi_reduction <maximumf>, %72, %cst_47 [1] : vector<8x32xf32> to vector<8xf32>
    %74 = vector.shape_cast %73 : vector<8xf32> to vector<8x1xf32>
    %75 = vector.extract_strided_slice %72 {offsets = [0, 0], sizes = [8, 1], strides = [1, 1]} : vector<8x32xf32> to vector<8x1xf32>
    %76 = arith.cmpf oge, %75, %74 : vector<8x1xf32>
    %77 = tpu.iota {dimensions = array<i32: 0>} : vector<8x1xi32>
    %c8_i32 = arith.constant 8 : i32
    %78 = vector.broadcast %c8_i32 : i32 to vector<8x1xi32>
    %79 = arith.select %76, %77, %78 : vector<8x1xi1>, vector<8x1xi32>
    %cst_48 = arith.constant dense<2147483647> : vector<1xi32>
    %80 = vector.multi_reduction <minsi>, %79, %cst_48 [0] : vector<8x1xi32> to vector<1xi32>
    %81 = vector.shape_cast %80 : vector<1xi32> to vector<1x1xi32>
    %c8_i32_49 = arith.constant 8 : i32
    %82 = vector.broadcast %c8_i32_49 : i32 to vector<1x1xi32>
    %83 = arith.cmpi slt, %81, %82 : vector<1x1xi32>
    %c1_i32 = arith.constant 1 : i32
    %84 = vector.broadcast %c1_i32 : i32 to vector<1x1xi32>
    %85 = arith.addi %81, %84 : vector<1x1xi32>
    %c8_i32_50 = arith.constant 8 : i32
    %86 = vector.broadcast %c8_i32_50 : i32 to vector<1x1xi32>
    %87 = arith.select %83, %85, %86 : vector<1x1xi1>, vector<1x1xi32>
    %88 = vector.extract_strided_slice %67 {offsets = [0, 0], sizes = [8, 32], strides = [1, 1]} : vector<16x32xf32> to vector<8x32xf32>
    %89 = vector.extract_strided_slice %69 {offsets = [0, 0], sizes = [8, 32], strides = [1, 1]} : vector<16x32xf32> to vector<8x32xf32>
    %cst_51 = arith.constant dense<0.000000e+00> : vector<8x8xf32>
    %90 = tpu.matmul %88, %89, %cst_51 {dimension_numbers = #tpu.dot_dimension_numbers<[1], [1], [0], [0], [0, 0, 1, 0], [], []>} : vector<8x32xf32>, vector<8x32xf32>, vector<8x8xf32> -> vector<8x8xf32>
    %cst_52 = arith.constant 0.176776692 : f32
    %91 = vector.broadcast %cst_52 : f32 to vector<8x8xf32>
    %92 = arith.mulf %90, %91 : vector<8x8xf32>
    %93 = tpu.iota {dimensions = array<i32: 1>} : vector<8x8xi32>
    %94 = tpu.iota {dimensions = array<i32: 0>} : vector<8x8xi32>
    %95 = vector.broadcast %87 : vector<1x1xi32> to vector<8x8xi32>
    %96 = arith.cmpi slt, %93, %95 : vector<8x8xi32>
    %97 = arith.cmpi ne, %93, %94 : vector<8x8xi32>
    %98 = arith.andi %96, %97 : vector<8x8xi1>
    %cst_53 = arith.constant -1.000000e+30 : f32
    %99 = vector.broadcast %cst_53 : f32 to vector<8x8xf32>
    %100 = arith.select %98, %92, %99 : vector<8x8xi1>, vector<8x8xf32>
    %cst_54 = arith.constant dense<0xFF800000> : vector<8xf32>
    %101 = vector.multi_reduction <maximumf>, %100, %cst_54 [1] : vector<8x8xf32> to vector<8xf32>
    %102 = vector.shape_cast %101 : vector<8xf32> to vector<8x1xf32>
    %103 = vector.broadcast %102 : vector<8x1xf32> to vector<8x8xf32>
    %104 = arith.subf %100, %103 : vector<8x8xf32>
    %105 = math.exp %104 : vector<8x8xf32>
    %cst_55 = arith.constant dense<0.000000e+00> : vector<8xf32>
    %106 = vector.multi_reduction <add>, %105, %cst_55 [1] : vector<8x8xf32> to vector<8xf32>
    %107 = vector.shape_cast %106 : vector<8xf32> to vector<8x1xf32>
    %108 = tpu.reciprocal %107 {approx = true} : vector<8x1xf32> -> vector<8x1xf32>
    %109 = vector.broadcast %108 : vector<8x1xf32> to vector<8x8xf32>
    %110 = arith.mulf %105, %109 : vector<8x8xf32>
    %111 = vector.extract_strided_slice %71 {offsets = [0, 0], sizes = [8, 32], strides = [1, 1]} : vector<16x32xf32> to vector<8x32xf32>
    %cst_56 = arith.constant dense<0.000000e+00> : vector<8x32xf32>
    %112 = tpu.matmul %110, %111, %cst_56 {dimension_numbers = #tpu.dot_dimension_numbers<[1], [0], [0], [1], [0, 0, 1, 1], [], []>} : vector<8x8xf32>, vector<8x32xf32>, vector<8x32xf32> -> vector<8x32xf32>
    %113 = vector.extract_strided_slice %50 {offsets = [8, 0], sizes = [8, 32], strides = [1, 1]} : vector<16x32xf32> to vector<8x32xf32>
    %cst_57 = arith.constant dense<0xFF800000> : vector<8xf32>
    %114 = vector.multi_reduction <maximumf>, %113, %cst_57 [1] : vector<8x32xf32> to vector<8xf32>
    %115 = vector.shape_cast %114 : vector<8xf32> to vector<8x1xf32>
    %116 = vector.extract_strided_slice %113 {offsets = [0, 0], sizes = [8, 1], strides = [1, 1]} : vector<8x32xf32> to vector<8x1xf32>
    %117 = arith.cmpf oge, %116, %115 : vector<8x1xf32>
    %118 = tpu.iota {dimensions = array<i32: 0>} : vector<8x1xi32>
    %c8_i32_58 = arith.constant 8 : i32
    %119 = vector.broadcast %c8_i32_58 : i32 to vector<8x1xi32>
    %120 = arith.select %117, %118, %119 : vector<8x1xi1>, vector<8x1xi32>
    %cst_59 = arith.constant dense<2147483647> : vector<1xi32>
    %121 = vector.multi_reduction <minsi>, %120, %cst_59 [0] : vector<8x1xi32> to vector<1xi32>
    %122 = vector.shape_cast %121 : vector<1xi32> to vector<1x1xi32>
    %c8_i32_60 = arith.constant 8 : i32
    %123 = vector.broadcast %c8_i32_60 : i32 to vector<1x1xi32>
    %124 = arith.cmpi slt, %122, %123 : vector<1x1xi32>
    %c1_i32_61 = arith.constant 1 : i32
    %125 = vector.broadcast %c1_i32_61 : i32 to vector<1x1xi32>
    %126 = arith.addi %122, %125 : vector<1x1xi32>
    %c8_i32_62 = arith.constant 8 : i32
    %127 = vector.broadcast %c8_i32_62 : i32 to vector<1x1xi32>
    %128 = arith.select %124, %126, %127 : vector<1x1xi1>, vector<1x1xi32>
    %129 = vector.extract_strided_slice %67 {offsets = [8, 0], sizes = [8, 32], strides = [1, 1]} : vector<16x32xf32> to vector<8x32xf32>
    %130 = vector.extract_strided_slice %69 {offsets = [8, 0], sizes = [8, 32], strides = [1, 1]} : vector<16x32xf32> to vector<8x32xf32>
    %cst_63 = arith.constant dense<0.000000e+00> : vector<8x8xf32>
    %131 = tpu.matmul %129, %130, %cst_63 {dimension_numbers = #tpu.dot_dimension_numbers<[1], [1], [0], [0], [0, 0, 1, 0], [], []>} : vector<8x32xf32>, vector<8x32xf32>, vector<8x8xf32> -> vector<8x8xf32>
    %cst_64 = arith.constant 0.176776692 : f32
    %132 = vector.broadcast %cst_64 : f32 to vector<8x8xf32>
    %133 = arith.mulf %131, %132 : vector<8x8xf32>
    %134 = tpu.iota {dimensions = array<i32: 1>} : vector<8x8xi32>
    %135 = tpu.iota {dimensions = array<i32: 0>} : vector<8x8xi32>
    %136 = vector.broadcast %128 : vector<1x1xi32> to vector<8x8xi32>
    %137 = arith.cmpi slt, %134, %136 : vector<8x8xi32>
    %138 = arith.cmpi ne, %134, %135 : vector<8x8xi32>
    %139 = arith.andi %137, %138 : vector<8x8xi1>
    %cst_65 = arith.constant -1.000000e+30 : f32
    %140 = vector.broadcast %cst_65 : f32 to vector<8x8xf32>
    %141 = arith.select %139, %133, %140 : vector<8x8xi1>, vector<8x8xf32>
    %cst_66 = arith.constant dense<0xFF800000> : vector<8xf32>
    %142 = vector.multi_reduction <maximumf>, %141, %cst_66 [1] : vector<8x8xf32> to vector<8xf32>
    %143 = vector.shape_cast %142 : vector<8xf32> to vector<8x1xf32>
    %144 = vector.broadcast %143 : vector<8x1xf32> to vector<8x8xf32>
    %145 = arith.subf %141, %144 : vector<8x8xf32>
    %146 = math.exp %145 : vector<8x8xf32>
    %cst_67 = arith.constant dense<0.000000e+00> : vector<8xf32>
    %147 = vector.multi_reduction <add>, %146, %cst_67 [1] : vector<8x8xf32> to vector<8xf32>
    %148 = vector.shape_cast %147 : vector<8xf32> to vector<8x1xf32>
    %149 = tpu.reciprocal %148 {approx = true} : vector<8x1xf32> -> vector<8x1xf32>
    %150 = vector.broadcast %149 : vector<8x1xf32> to vector<8x8xf32>
    %151 = arith.mulf %146, %150 : vector<8x8xf32>
    %152 = vector.extract_strided_slice %71 {offsets = [8, 0], sizes = [8, 32], strides = [1, 1]} : vector<16x32xf32> to vector<8x32xf32>
    %cst_68 = arith.constant dense<0.000000e+00> : vector<8x32xf32>
    %153 = tpu.matmul %151, %152, %cst_68 {dimension_numbers = #tpu.dot_dimension_numbers<[1], [0], [0], [1], [0, 0, 1, 1], [], []>} : vector<8x8xf32>, vector<8x32xf32>, vector<8x32xf32> -> vector<8x32xf32>
    %154 = tpu.concatenate %112, %153 in 0 : vector<8x32xf32>, vector<8x32xf32> -> vector<16x32xf32>
    %c0_69 = arith.constant 0 : index
    %c0_70 = arith.constant 0 : index
    %155 = vector.load %arg14[%c0_69, %c0_70] : memref<32x32xf32, #tpu.memory_space<vmem>>, vector<32x32xf32>
    %cst_71 = arith.constant dense<0.000000e+00> : vector<16x32xf32>
    %156 = tpu.matmul %154, %155, %cst_71 {dimension_numbers = #tpu.dot_dimension_numbers<[1], [0], [0], [1], [0, 0, 1, 1], [], []>} : vector<16x32xf32>, vector<32x32xf32>, vector<16x32xf32> -> vector<16x32xf32>
    %c0_72 = arith.constant 0 : index
    %c0_73 = arith.constant 0 : index
    %157 = vector.load %arg15[%c0_72, %c0_73] : memref<32x32xf32, #tpu.memory_space<vmem>>, vector<32x32xf32>
    %cst_74 = arith.constant dense<0.000000e+00> : vector<16x32xf32>
    %158 = tpu.matmul %45, %157, %cst_74 {dimension_numbers = #tpu.dot_dimension_numbers<[1], [0], [0], [1], [0, 0, 1, 1], [], []>} : vector<16x32xf32>, vector<32x32xf32>, vector<16x32xf32> -> vector<16x32xf32>
    %159 = arith.addf %156, %158 : vector<16x32xf32>
    %c0_75 = arith.constant 0 : index
    %c0_76 = arith.constant 0 : index
    %160 = vector.load %arg16[%c0_75, %c0_76] : memref<1x32xf32, #tpu.memory_space<vmem>>, vector<1x32xf32>
    %161 = vector.broadcast %160 : vector<1x32xf32> to vector<16x32xf32>
    %162 = arith.addf %159, %161 : vector<16x32xf32>
    %163 = arith.negf %162 : vector<16x32xf32>
    %164 = math.exp %163 : vector<16x32xf32>
    %cst_77 = arith.constant 1.000000e+00 : f32
    %165 = vector.broadcast %cst_77 : f32 to vector<16x32xf32>
    %166 = arith.addf %165, %164 : vector<16x32xf32>
    %167 = arith.divf %165, %166 : vector<16x32xf32>
    %168 = arith.mulf %167, %45 : vector<16x32xf32>
    %cst_78 = arith.constant 1.000000e+00 : f32
    %169 = vector.broadcast %cst_78 : f32 to vector<16x32xf32>
    %170 = arith.subf %169, %167 : vector<16x32xf32>
    %171 = arith.mulf %170, %154 : vector<16x32xf32>
    %172 = arith.addf %168, %171 : vector<16x32xf32>
    %c0_79 = arith.constant 0 : index
    %c0_80 = arith.constant 0 : index
    %173 = vector.load %arg17[%c0_79, %c0_80] : memref<32x32xf32, #tpu.memory_space<vmem>>, vector<32x32xf32>
    %cst_81 = arith.constant dense<0.000000e+00> : vector<16x32xf32>
    %174 = tpu.matmul %172, %173, %cst_81 {dimension_numbers = #tpu.dot_dimension_numbers<[1], [0], [0], [1], [0, 0, 1, 1], [], []>} : vector<16x32xf32>, vector<32x32xf32>, vector<16x32xf32> -> vector<16x32xf32>
    %c0_82 = arith.constant 0 : index
    %c0_83 = arith.constant 0 : index
    %175 = vector.load %arg18[%c0_82, %c0_83] : memref<1x32xf32, #tpu.memory_space<vmem>>, vector<1x32xf32>
    %176 = vector.broadcast %175 : vector<1x32xf32> to vector<16x32xf32>
    %177 = arith.addf %174, %176 : vector<16x32xf32>
    %cst_84 = arith.constant dense<0xFF800000> : vector<16xf32>
    %178 = vector.multi_reduction <maximumf>, %177, %cst_84 [1] : vector<16x32xf32> to vector<16xf32>
    %179 = vector.shape_cast %178 : vector<16xf32> to vector<16x1xf32>
    %180 = vector.broadcast %179 : vector<16x1xf32> to vector<16x32xf32>
    %181 = arith.subf %177, %180 : vector<16x32xf32>
    %182 = math.exp %181 : vector<16x32xf32>
    %cst_85 = arith.constant dense<0.000000e+00> : vector<16xf32>
    %183 = vector.multi_reduction <add>, %182, %cst_85 [1] : vector<16x32xf32> to vector<16xf32>
    %184 = vector.shape_cast %183 : vector<16xf32> to vector<16x1xf32>
    %185 = tpu.reciprocal %184 {approx = true} : vector<16x1xf32> -> vector<16x1xf32>
    %186 = vector.broadcast %185 : vector<16x1xf32> to vector<16x32xf32>
    %187 = arith.mulf %182, %186 : vector<16x32xf32>
    %c0_86 = arith.constant 0 : index
    %c0_87 = arith.constant 0 : index
    %188 = vector.load %arg7[%c0_86, %c0_87] : memref<32x32xf32, #tpu.memory_space<vmem>>, vector<32x32xf32>
    %cst_88 = arith.constant dense<0.000000e+00> : vector<16x32xf32>
    %189 = tpu.matmul %187, %188, %cst_88 {dimension_numbers = #tpu.dot_dimension_numbers<[1], [0], [0], [1], [0, 0, 1, 1], [], []>} : vector<16x32xf32>, vector<32x32xf32>, vector<16x32xf32> -> vector<16x32xf32>
    %c0_89 = arith.constant 0 : index
    %c0_90 = arith.constant 0 : index
    %190 = vector.load %arg8[%c0_89, %c0_90] : memref<16x32xf32, #tpu.memory_space<vmem>>, vector<16x32xf32>
    %191 = arith.addf %189, %190 : vector<16x32xf32>
    %c0_91 = arith.constant 0 : index
    %c0_92 = arith.constant 0 : index
    %192 = vector.load %arg9[%c0_91, %c0_92] : memref<32x32xf32, #tpu.memory_space<vmem>>, vector<32x32xf32>
    %cst_93 = arith.constant dense<0.000000e+00> : vector<16x32xf32>
    %193 = tpu.matmul %191, %192, %cst_93 {dimension_numbers = #tpu.dot_dimension_numbers<[1], [0], [0], [1], [0, 0, 1, 1], [], []>} : vector<16x32xf32>, vector<32x32xf32>, vector<16x32xf32> -> vector<16x32xf32>
    %c0_94 = arith.constant 0 : index
    %c0_95 = arith.constant 0 : index
    %194 = vector.load %arg10[%c0_94, %c0_95] : memref<32x32xf32, #tpu.memory_space<vmem>>, vector<32x32xf32>
    %cst_96 = arith.constant dense<0.000000e+00> : vector<16x32xf32>
    %195 = tpu.matmul %191, %194, %cst_96 {dimension_numbers = #tpu.dot_dimension_numbers<[1], [0], [0], [1], [0, 0, 1, 1], [], []>} : vector<16x32xf32>, vector<32x32xf32>, vector<16x32xf32> -> vector<16x32xf32>
    %c0_97 = arith.constant 0 : index
    %c0_98 = arith.constant 0 : index
    %196 = vector.load %arg11[%c0_97, %c0_98] : memref<32x32xf32, #tpu.memory_space<vmem>>, vector<32x32xf32>
    %cst_99 = arith.constant dense<0.000000e+00> : vector<16x32xf32>
    %197 = tpu.matmul %191, %196, %cst_99 {dimension_numbers = #tpu.dot_dimension_numbers<[1], [0], [0], [1], [0, 0, 1, 1], [], []>} : vector<16x32xf32>, vector<32x32xf32>, vector<16x32xf32> -> vector<16x32xf32>
    %198 = vector.extract_strided_slice %177 {offsets = [0, 0], sizes = [8, 32], strides = [1, 1]} : vector<16x32xf32> to vector<8x32xf32>
    %cst_100 = arith.constant dense<0xFF800000> : vector<8xf32>
    %199 = vector.multi_reduction <maximumf>, %198, %cst_100 [1] : vector<8x32xf32> to vector<8xf32>
    %200 = vector.shape_cast %199 : vector<8xf32> to vector<8x1xf32>
    %201 = vector.extract_strided_slice %198 {offsets = [0, 0], sizes = [8, 1], strides = [1, 1]} : vector<8x32xf32> to vector<8x1xf32>
    %202 = arith.cmpf oge, %201, %200 : vector<8x1xf32>
    %203 = tpu.iota {dimensions = array<i32: 0>} : vector<8x1xi32>
    %c8_i32_101 = arith.constant 8 : i32
    %204 = vector.broadcast %c8_i32_101 : i32 to vector<8x1xi32>
    %205 = arith.select %202, %203, %204 : vector<8x1xi1>, vector<8x1xi32>
    %cst_102 = arith.constant dense<2147483647> : vector<1xi32>
    %206 = vector.multi_reduction <minsi>, %205, %cst_102 [0] : vector<8x1xi32> to vector<1xi32>
    %207 = vector.shape_cast %206 : vector<1xi32> to vector<1x1xi32>
    %c8_i32_103 = arith.constant 8 : i32
    %208 = vector.broadcast %c8_i32_103 : i32 to vector<1x1xi32>
    %209 = arith.cmpi slt, %207, %208 : vector<1x1xi32>
    %c1_i32_104 = arith.constant 1 : i32
    %210 = vector.broadcast %c1_i32_104 : i32 to vector<1x1xi32>
    %211 = arith.addi %207, %210 : vector<1x1xi32>
    %c8_i32_105 = arith.constant 8 : i32
    %212 = vector.broadcast %c8_i32_105 : i32 to vector<1x1xi32>
    %213 = arith.select %209, %211, %212 : vector<1x1xi1>, vector<1x1xi32>
    %214 = vector.extract_strided_slice %193 {offsets = [0, 0], sizes = [8, 32], strides = [1, 1]} : vector<16x32xf32> to vector<8x32xf32>
    %215 = vector.extract_strided_slice %195 {offsets = [0, 0], sizes = [8, 32], strides = [1, 1]} : vector<16x32xf32> to vector<8x32xf32>
    %cst_106 = arith.constant dense<0.000000e+00> : vector<8x8xf32>
    %216 = tpu.matmul %214, %215, %cst_106 {dimension_numbers = #tpu.dot_dimension_numbers<[1], [1], [0], [0], [0, 0, 1, 0], [], []>} : vector<8x32xf32>, vector<8x32xf32>, vector<8x8xf32> -> vector<8x8xf32>
    %cst_107 = arith.constant 0.176776692 : f32
    %217 = vector.broadcast %cst_107 : f32 to vector<8x8xf32>
    %218 = arith.mulf %216, %217 : vector<8x8xf32>
    %219 = tpu.iota {dimensions = array<i32: 1>} : vector<8x8xi32>
    %220 = tpu.iota {dimensions = array<i32: 0>} : vector<8x8xi32>
    %221 = vector.broadcast %213 : vector<1x1xi32> to vector<8x8xi32>
    %222 = arith.cmpi slt, %219, %221 : vector<8x8xi32>
    %223 = arith.cmpi ne, %219, %220 : vector<8x8xi32>
    %224 = arith.andi %222, %223 : vector<8x8xi1>
    %cst_108 = arith.constant -1.000000e+30 : f32
    %225 = vector.broadcast %cst_108 : f32 to vector<8x8xf32>
    %226 = arith.select %224, %218, %225 : vector<8x8xi1>, vector<8x8xf32>
    %cst_109 = arith.constant dense<0xFF800000> : vector<8xf32>
    %227 = vector.multi_reduction <maximumf>, %226, %cst_109 [1] : vector<8x8xf32> to vector<8xf32>
    %228 = vector.shape_cast %227 : vector<8xf32> to vector<8x1xf32>
    %229 = vector.broadcast %228 : vector<8x1xf32> to vector<8x8xf32>
    %230 = arith.subf %226, %229 : vector<8x8xf32>
    %231 = math.exp %230 : vector<8x8xf32>
    %cst_110 = arith.constant dense<0.000000e+00> : vector<8xf32>
    %232 = vector.multi_reduction <add>, %231, %cst_110 [1] : vector<8x8xf32> to vector<8xf32>
    %233 = vector.shape_cast %232 : vector<8xf32> to vector<8x1xf32>
    %234 = tpu.reciprocal %233 {approx = true} : vector<8x1xf32> -> vector<8x1xf32>
    %235 = vector.broadcast %234 : vector<8x1xf32> to vector<8x8xf32>
    %236 = arith.mulf %231, %235 : vector<8x8xf32>
    %237 = vector.extract_strided_slice %197 {offsets = [0, 0], sizes = [8, 32], strides = [1, 1]} : vector<16x32xf32> to vector<8x32xf32>
    %cst_111 = arith.constant dense<0.000000e+00> : vector<8x32xf32>
    %238 = tpu.matmul %236, %237, %cst_111 {dimension_numbers = #tpu.dot_dimension_numbers<[1], [0], [0], [1], [0, 0, 1, 1], [], []>} : vector<8x8xf32>, vector<8x32xf32>, vector<8x32xf32> -> vector<8x32xf32>
    %239 = vector.extract_strided_slice %177 {offsets = [8, 0], sizes = [8, 32], strides = [1, 1]} : vector<16x32xf32> to vector<8x32xf32>
    %cst_112 = arith.constant dense<0xFF800000> : vector<8xf32>
    %240 = vector.multi_reduction <maximumf>, %239, %cst_112 [1] : vector<8x32xf32> to vector<8xf32>
    %241 = vector.shape_cast %240 : vector<8xf32> to vector<8x1xf32>
    %242 = vector.extract_strided_slice %239 {offsets = [0, 0], sizes = [8, 1], strides = [1, 1]} : vector<8x32xf32> to vector<8x1xf32>
    %243 = arith.cmpf oge, %242, %241 : vector<8x1xf32>
    %244 = tpu.iota {dimensions = array<i32: 0>} : vector<8x1xi32>
    %c8_i32_113 = arith.constant 8 : i32
    %245 = vector.broadcast %c8_i32_113 : i32 to vector<8x1xi32>
    %246 = arith.select %243, %244, %245 : vector<8x1xi1>, vector<8x1xi32>
    %cst_114 = arith.constant dense<2147483647> : vector<1xi32>
    %247 = vector.multi_reduction <minsi>, %246, %cst_114 [0] : vector<8x1xi32> to vector<1xi32>
    %248 = vector.shape_cast %247 : vector<1xi32> to vector<1x1xi32>
    %c8_i32_115 = arith.constant 8 : i32
    %249 = vector.broadcast %c8_i32_115 : i32 to vector<1x1xi32>
    %250 = arith.cmpi slt, %248, %249 : vector<1x1xi32>
    %c1_i32_116 = arith.constant 1 : i32
    %251 = vector.broadcast %c1_i32_116 : i32 to vector<1x1xi32>
    %252 = arith.addi %248, %251 : vector<1x1xi32>
    %c8_i32_117 = arith.constant 8 : i32
    %253 = vector.broadcast %c8_i32_117 : i32 to vector<1x1xi32>
    %254 = arith.select %250, %252, %253 : vector<1x1xi1>, vector<1x1xi32>
    %255 = vector.extract_strided_slice %193 {offsets = [8, 0], sizes = [8, 32], strides = [1, 1]} : vector<16x32xf32> to vector<8x32xf32>
    %256 = vector.extract_strided_slice %195 {offsets = [8, 0], sizes = [8, 32], strides = [1, 1]} : vector<16x32xf32> to vector<8x32xf32>
    %cst_118 = arith.constant dense<0.000000e+00> : vector<8x8xf32>
    %257 = tpu.matmul %255, %256, %cst_118 {dimension_numbers = #tpu.dot_dimension_numbers<[1], [1], [0], [0], [0, 0, 1, 0], [], []>} : vector<8x32xf32>, vector<8x32xf32>, vector<8x8xf32> -> vector<8x8xf32>
    %cst_119 = arith.constant 0.176776692 : f32
    %258 = vector.broadcast %cst_119 : f32 to vector<8x8xf32>
    %259 = arith.mulf %257, %258 : vector<8x8xf32>
    %260 = tpu.iota {dimensions = array<i32: 1>} : vector<8x8xi32>
    %261 = tpu.iota {dimensions = array<i32: 0>} : vector<8x8xi32>
    %262 = vector.broadcast %254 : vector<1x1xi32> to vector<8x8xi32>
    %263 = arith.cmpi slt, %260, %262 : vector<8x8xi32>
    %264 = arith.cmpi ne, %260, %261 : vector<8x8xi32>
    %265 = arith.andi %263, %264 : vector<8x8xi1>
    %cst_120 = arith.constant -1.000000e+30 : f32
    %266 = vector.broadcast %cst_120 : f32 to vector<8x8xf32>
    %267 = arith.select %265, %259, %266 : vector<8x8xi1>, vector<8x8xf32>
    %cst_121 = arith.constant dense<0xFF800000> : vector<8xf32>
    %268 = vector.multi_reduction <maximumf>, %267, %cst_121 [1] : vector<8x8xf32> to vector<8xf32>
    %269 = vector.shape_cast %268 : vector<8xf32> to vector<8x1xf32>
    %270 = vector.broadcast %269 : vector<8x1xf32> to vector<8x8xf32>
    %271 = arith.subf %267, %270 : vector<8x8xf32>
    %272 = math.exp %271 : vector<8x8xf32>
    %cst_122 = arith.constant dense<0.000000e+00> : vector<8xf32>
    %273 = vector.multi_reduction <add>, %272, %cst_122 [1] : vector<8x8xf32> to vector<8xf32>
    %274 = vector.shape_cast %273 : vector<8xf32> to vector<8x1xf32>
    %275 = tpu.reciprocal %274 {approx = true} : vector<8x1xf32> -> vector<8x1xf32>
    %276 = vector.broadcast %275 : vector<8x1xf32> to vector<8x8xf32>
    %277 = arith.mulf %272, %276 : vector<8x8xf32>
    %278 = vector.extract_strided_slice %197 {offsets = [8, 0], sizes = [8, 32], strides = [1, 1]} : vector<16x32xf32> to vector<8x32xf32>
    %cst_123 = arith.constant dense<0.000000e+00> : vector<8x32xf32>
    %279 = tpu.matmul %277, %278, %cst_123 {dimension_numbers = #tpu.dot_dimension_numbers<[1], [0], [0], [1], [0, 0, 1, 1], [], []>} : vector<8x8xf32>, vector<8x32xf32>, vector<8x32xf32> -> vector<8x32xf32>
    %280 = tpu.concatenate %238, %279 in 0 : vector<8x32xf32>, vector<8x32xf32> -> vector<16x32xf32>
    %c0_124 = arith.constant 0 : index
    %c0_125 = arith.constant 0 : index
    %281 = vector.load %arg14[%c0_124, %c0_125] : memref<32x32xf32, #tpu.memory_space<vmem>>, vector<32x32xf32>
    %cst_126 = arith.constant dense<0.000000e+00> : vector<16x32xf32>
    %282 = tpu.matmul %280, %281, %cst_126 {dimension_numbers = #tpu.dot_dimension_numbers<[1], [0], [0], [1], [0, 0, 1, 1], [], []>} : vector<16x32xf32>, vector<32x32xf32>, vector<16x32xf32> -> vector<16x32xf32>
    %c0_127 = arith.constant 0 : index
    %c0_128 = arith.constant 0 : index
    %283 = vector.load %arg15[%c0_127, %c0_128] : memref<32x32xf32, #tpu.memory_space<vmem>>, vector<32x32xf32>
    %cst_129 = arith.constant dense<0.000000e+00> : vector<16x32xf32>
    %284 = tpu.matmul %45, %283, %cst_129 {dimension_numbers = #tpu.dot_dimension_numbers<[1], [0], [0], [1], [0, 0, 1, 1], [], []>} : vector<16x32xf32>, vector<32x32xf32>, vector<16x32xf32> -> vector<16x32xf32>
    %285 = arith.addf %282, %284 : vector<16x32xf32>
    %c0_130 = arith.constant 0 : index
    %c0_131 = arith.constant 0 : index
    %286 = vector.load %arg16[%c0_130, %c0_131] : memref<1x32xf32, #tpu.memory_space<vmem>>, vector<1x32xf32>
    %287 = vector.broadcast %286 : vector<1x32xf32> to vector<16x32xf32>
    %288 = arith.addf %285, %287 : vector<16x32xf32>
    %289 = arith.negf %288 : vector<16x32xf32>
    %290 = math.exp %289 : vector<16x32xf32>
    %cst_132 = arith.constant 1.000000e+00 : f32
    %291 = vector.broadcast %cst_132 : f32 to vector<16x32xf32>
    %292 = arith.addf %291, %290 : vector<16x32xf32>
    %293 = arith.divf %291, %292 : vector<16x32xf32>
    %294 = arith.mulf %293, %45 : vector<16x32xf32>
    %cst_133 = arith.constant 1.000000e+00 : f32
    %295 = vector.broadcast %cst_133 : f32 to vector<16x32xf32>
    %296 = arith.subf %295, %293 : vector<16x32xf32>
    %297 = arith.mulf %296, %280 : vector<16x32xf32>
    %298 = arith.addf %294, %297 : vector<16x32xf32>
    %c0_134 = arith.constant 0 : index
    %c0_135 = arith.constant 0 : index
    %299 = vector.load %arg17[%c0_134, %c0_135] : memref<32x32xf32, #tpu.memory_space<vmem>>, vector<32x32xf32>
    %cst_136 = arith.constant dense<0.000000e+00> : vector<16x32xf32>
    %300 = tpu.matmul %298, %299, %cst_136 {dimension_numbers = #tpu.dot_dimension_numbers<[1], [0], [0], [1], [0, 0, 1, 1], [], []>} : vector<16x32xf32>, vector<32x32xf32>, vector<16x32xf32> -> vector<16x32xf32>
    %c0_137 = arith.constant 0 : index
    %c0_138 = arith.constant 0 : index
    %301 = vector.load %arg18[%c0_137, %c0_138] : memref<1x32xf32, #tpu.memory_space<vmem>>, vector<1x32xf32>
    %302 = vector.broadcast %301 : vector<1x32xf32> to vector<16x32xf32>
    %303 = arith.addf %300, %302 : vector<16x32xf32>
    %cst_139 = arith.constant dense<0xFF800000> : vector<16xf32>
    %304 = vector.multi_reduction <maximumf>, %303, %cst_139 [1] : vector<16x32xf32> to vector<16xf32>
    %305 = vector.shape_cast %304 : vector<16xf32> to vector<16x1xf32>
    %306 = vector.broadcast %305 : vector<16x1xf32> to vector<16x32xf32>
    %307 = arith.subf %303, %306 : vector<16x32xf32>
    %308 = math.exp %307 : vector<16x32xf32>
    %cst_140 = arith.constant dense<0.000000e+00> : vector<16xf32>
    %309 = vector.multi_reduction <add>, %308, %cst_140 [1] : vector<16x32xf32> to vector<16xf32>
    %310 = vector.shape_cast %309 : vector<16xf32> to vector<16x1xf32>
    %311 = tpu.reciprocal %310 {approx = true} : vector<16x1xf32> -> vector<16x1xf32>
    %312 = vector.broadcast %311 : vector<16x1xf32> to vector<16x32xf32>
    %313 = arith.mulf %308, %312 : vector<16x32xf32>
    %c0_141 = arith.constant 0 : index
    %c0_142 = arith.constant 0 : index
    %314 = vector.load %arg7[%c0_141, %c0_142] : memref<32x32xf32, #tpu.memory_space<vmem>>, vector<32x32xf32>
    %cst_143 = arith.constant dense<0.000000e+00> : vector<16x32xf32>
    %315 = tpu.matmul %313, %314, %cst_143 {dimension_numbers = #tpu.dot_dimension_numbers<[1], [0], [0], [1], [0, 0, 1, 1], [], []>} : vector<16x32xf32>, vector<32x32xf32>, vector<16x32xf32> -> vector<16x32xf32>
    %c0_144 = arith.constant 0 : index
    %c0_145 = arith.constant 0 : index
    %316 = vector.load %arg8[%c0_144, %c0_145] : memref<16x32xf32, #tpu.memory_space<vmem>>, vector<16x32xf32>
    %317 = arith.addf %315, %316 : vector<16x32xf32>
    %c0_146 = arith.constant 0 : index
    %c0_147 = arith.constant 0 : index
    %318 = vector.load %arg9[%c0_146, %c0_147] : memref<32x32xf32, #tpu.memory_space<vmem>>, vector<32x32xf32>
    %cst_148 = arith.constant dense<0.000000e+00> : vector<16x32xf32>
    %319 = tpu.matmul %317, %318, %cst_148 {dimension_numbers = #tpu.dot_dimension_numbers<[1], [0], [0], [1], [0, 0, 1, 1], [], []>} : vector<16x32xf32>, vector<32x32xf32>, vector<16x32xf32> -> vector<16x32xf32>
    %c0_149 = arith.constant 0 : index
    %c0_150 = arith.constant 0 : index
    %320 = vector.load %arg10[%c0_149, %c0_150] : memref<32x32xf32, #tpu.memory_space<vmem>>, vector<32x32xf32>
    %cst_151 = arith.constant dense<0.000000e+00> : vector<16x32xf32>
    %321 = tpu.matmul %317, %320, %cst_151 {dimension_numbers = #tpu.dot_dimension_numbers<[1], [0], [0], [1], [0, 0, 1, 1], [], []>} : vector<16x32xf32>, vector<32x32xf32>, vector<16x32xf32> -> vector<16x32xf32>
    %c0_152 = arith.constant 0 : index
    %c0_153 = arith.constant 0 : index
    %322 = vector.load %arg11[%c0_152, %c0_153] : memref<32x32xf32, #tpu.memory_space<vmem>>, vector<32x32xf32>
    %cst_154 = arith.constant dense<0.000000e+00> : vector<16x32xf32>
    %323 = tpu.matmul %317, %322, %cst_154 {dimension_numbers = #tpu.dot_dimension_numbers<[1], [0], [0], [1], [0, 0, 1, 1], [], []>} : vector<16x32xf32>, vector<32x32xf32>, vector<16x32xf32> -> vector<16x32xf32>
    %324 = vector.extract_strided_slice %303 {offsets = [0, 0], sizes = [8, 32], strides = [1, 1]} : vector<16x32xf32> to vector<8x32xf32>
    %cst_155 = arith.constant dense<0xFF800000> : vector<8xf32>
    %325 = vector.multi_reduction <maximumf>, %324, %cst_155 [1] : vector<8x32xf32> to vector<8xf32>
    %326 = vector.shape_cast %325 : vector<8xf32> to vector<8x1xf32>
    %327 = vector.extract_strided_slice %324 {offsets = [0, 0], sizes = [8, 1], strides = [1, 1]} : vector<8x32xf32> to vector<8x1xf32>
    %328 = arith.cmpf oge, %327, %326 : vector<8x1xf32>
    %329 = tpu.iota {dimensions = array<i32: 0>} : vector<8x1xi32>
    %c8_i32_156 = arith.constant 8 : i32
    %330 = vector.broadcast %c8_i32_156 : i32 to vector<8x1xi32>
    %331 = arith.select %328, %329, %330 : vector<8x1xi1>, vector<8x1xi32>
    %cst_157 = arith.constant dense<2147483647> : vector<1xi32>
    %332 = vector.multi_reduction <minsi>, %331, %cst_157 [0] : vector<8x1xi32> to vector<1xi32>
    %333 = vector.shape_cast %332 : vector<1xi32> to vector<1x1xi32>
    %c8_i32_158 = arith.constant 8 : i32
    %334 = vector.broadcast %c8_i32_158 : i32 to vector<1x1xi32>
    %335 = arith.cmpi slt, %333, %334 : vector<1x1xi32>
    %c1_i32_159 = arith.constant 1 : i32
    %336 = vector.broadcast %c1_i32_159 : i32 to vector<1x1xi32>
    %337 = arith.addi %333, %336 : vector<1x1xi32>
    %c8_i32_160 = arith.constant 8 : i32
    %338 = vector.broadcast %c8_i32_160 : i32 to vector<1x1xi32>
    %339 = arith.select %335, %337, %338 : vector<1x1xi1>, vector<1x1xi32>
    %340 = vector.extract_strided_slice %319 {offsets = [0, 0], sizes = [8, 32], strides = [1, 1]} : vector<16x32xf32> to vector<8x32xf32>
    %341 = vector.extract_strided_slice %321 {offsets = [0, 0], sizes = [8, 32], strides = [1, 1]} : vector<16x32xf32> to vector<8x32xf32>
    %cst_161 = arith.constant dense<0.000000e+00> : vector<8x8xf32>
    %342 = tpu.matmul %340, %341, %cst_161 {dimension_numbers = #tpu.dot_dimension_numbers<[1], [1], [0], [0], [0, 0, 1, 0], [], []>} : vector<8x32xf32>, vector<8x32xf32>, vector<8x8xf32> -> vector<8x8xf32>
    %cst_162 = arith.constant 0.176776692 : f32
    %343 = vector.broadcast %cst_162 : f32 to vector<8x8xf32>
    %344 = arith.mulf %342, %343 : vector<8x8xf32>
    %345 = tpu.iota {dimensions = array<i32: 1>} : vector<8x8xi32>
    %346 = tpu.iota {dimensions = array<i32: 0>} : vector<8x8xi32>
    %347 = vector.broadcast %339 : vector<1x1xi32> to vector<8x8xi32>
    %348 = arith.cmpi slt, %345, %347 : vector<8x8xi32>
    %349 = arith.cmpi ne, %345, %346 : vector<8x8xi32>
    %350 = arith.andi %348, %349 : vector<8x8xi1>
    %cst_163 = arith.constant -1.000000e+30 : f32
    %351 = vector.broadcast %cst_163 : f32 to vector<8x8xf32>
    %352 = arith.select %350, %344, %351 : vector<8x8xi1>, vector<8x8xf32>
    %cst_164 = arith.constant dense<0xFF800000> : vector<8xf32>
    %353 = vector.multi_reduction <maximumf>, %352, %cst_164 [1] : vector<8x8xf32> to vector<8xf32>
    %354 = vector.shape_cast %353 : vector<8xf32> to vector<8x1xf32>
    %355 = vector.broadcast %354 : vector<8x1xf32> to vector<8x8xf32>
    %356 = arith.subf %352, %355 : vector<8x8xf32>
    %357 = math.exp %356 : vector<8x8xf32>
    %cst_165 = arith.constant dense<0.000000e+00> : vector<8xf32>
    %358 = vector.multi_reduction <add>, %357, %cst_165 [1] : vector<8x8xf32> to vector<8xf32>
    %359 = vector.shape_cast %358 : vector<8xf32> to vector<8x1xf32>
    %360 = tpu.reciprocal %359 {approx = true} : vector<8x1xf32> -> vector<8x1xf32>
    %361 = vector.broadcast %360 : vector<8x1xf32> to vector<8x8xf32>
    %362 = arith.mulf %357, %361 : vector<8x8xf32>
    %363 = vector.extract_strided_slice %323 {offsets = [0, 0], sizes = [8, 32], strides = [1, 1]} : vector<16x32xf32> to vector<8x32xf32>
    %cst_166 = arith.constant dense<0.000000e+00> : vector<8x32xf32>
    %364 = tpu.matmul %362, %363, %cst_166 {dimension_numbers = #tpu.dot_dimension_numbers<[1], [0], [0], [1], [0, 0, 1, 1], [], []>} : vector<8x8xf32>, vector<8x32xf32>, vector<8x32xf32> -> vector<8x32xf32>
    %365 = vector.extract_strided_slice %303 {offsets = [8, 0], sizes = [8, 32], strides = [1, 1]} : vector<16x32xf32> to vector<8x32xf32>
    %cst_167 = arith.constant dense<0xFF800000> : vector<8xf32>
    %366 = vector.multi_reduction <maximumf>, %365, %cst_167 [1] : vector<8x32xf32> to vector<8xf32>
    %367 = vector.shape_cast %366 : vector<8xf32> to vector<8x1xf32>
    %368 = vector.extract_strided_slice %365 {offsets = [0, 0], sizes = [8, 1], strides = [1, 1]} : vector<8x32xf32> to vector<8x1xf32>
    %369 = arith.cmpf oge, %368, %367 : vector<8x1xf32>
    %370 = tpu.iota {dimensions = array<i32: 0>} : vector<8x1xi32>
    %c8_i32_168 = arith.constant 8 : i32
    %371 = vector.broadcast %c8_i32_168 : i32 to vector<8x1xi32>
    %372 = arith.select %369, %370, %371 : vector<8x1xi1>, vector<8x1xi32>
    %cst_169 = arith.constant dense<2147483647> : vector<1xi32>
    %373 = vector.multi_reduction <minsi>, %372, %cst_169 [0] : vector<8x1xi32> to vector<1xi32>
    %374 = vector.shape_cast %373 : vector<1xi32> to vector<1x1xi32>
    %c8_i32_170 = arith.constant 8 : i32
    %375 = vector.broadcast %c8_i32_170 : i32 to vector<1x1xi32>
    %376 = arith.cmpi slt, %374, %375 : vector<1x1xi32>
    %c1_i32_171 = arith.constant 1 : i32
    %377 = vector.broadcast %c1_i32_171 : i32 to vector<1x1xi32>
    %378 = arith.addi %374, %377 : vector<1x1xi32>
    %c8_i32_172 = arith.constant 8 : i32
    %379 = vector.broadcast %c8_i32_172 : i32 to vector<1x1xi32>
    %380 = arith.select %376, %378, %379 : vector<1x1xi1>, vector<1x1xi32>
    %381 = vector.extract_strided_slice %319 {offsets = [8, 0], sizes = [8, 32], strides = [1, 1]} : vector<16x32xf32> to vector<8x32xf32>
    %382 = vector.extract_strided_slice %321 {offsets = [8, 0], sizes = [8, 32], strides = [1, 1]} : vector<16x32xf32> to vector<8x32xf32>
    %cst_173 = arith.constant dense<0.000000e+00> : vector<8x8xf32>
    %383 = tpu.matmul %381, %382, %cst_173 {dimension_numbers = #tpu.dot_dimension_numbers<[1], [1], [0], [0], [0, 0, 1, 0], [], []>} : vector<8x32xf32>, vector<8x32xf32>, vector<8x8xf32> -> vector<8x8xf32>
    %cst_174 = arith.constant 0.176776692 : f32
    %384 = vector.broadcast %cst_174 : f32 to vector<8x8xf32>
    %385 = arith.mulf %383, %384 : vector<8x8xf32>
    %386 = tpu.iota {dimensions = array<i32: 1>} : vector<8x8xi32>
    %387 = tpu.iota {dimensions = array<i32: 0>} : vector<8x8xi32>
    %388 = vector.broadcast %380 : vector<1x1xi32> to vector<8x8xi32>
    %389 = arith.cmpi slt, %386, %388 : vector<8x8xi32>
    %390 = arith.cmpi ne, %386, %387 : vector<8x8xi32>
    %391 = arith.andi %389, %390 : vector<8x8xi1>
    %cst_175 = arith.constant -1.000000e+30 : f32
    %392 = vector.broadcast %cst_175 : f32 to vector<8x8xf32>
    %393 = arith.select %391, %385, %392 : vector<8x8xi1>, vector<8x8xf32>
    %cst_176 = arith.constant dense<0xFF800000> : vector<8xf32>
    %394 = vector.multi_reduction <maximumf>, %393, %cst_176 [1] : vector<8x8xf32> to vector<8xf32>
    %395 = vector.shape_cast %394 : vector<8xf32> to vector<8x1xf32>
    %396 = vector.broadcast %395 : vector<8x1xf32> to vector<8x8xf32>
    %397 = arith.subf %393, %396 : vector<8x8xf32>
    %398 = math.exp %397 : vector<8x8xf32>
    %cst_177 = arith.constant dense<0.000000e+00> : vector<8xf32>
    %399 = vector.multi_reduction <add>, %398, %cst_177 [1] : vector<8x8xf32> to vector<8xf32>
    %400 = vector.shape_cast %399 : vector<8xf32> to vector<8x1xf32>
    %401 = tpu.reciprocal %400 {approx = true} : vector<8x1xf32> -> vector<8x1xf32>
    %402 = vector.broadcast %401 : vector<8x1xf32> to vector<8x8xf32>
    %403 = arith.mulf %398, %402 : vector<8x8xf32>
    %404 = vector.extract_strided_slice %323 {offsets = [8, 0], sizes = [8, 32], strides = [1, 1]} : vector<16x32xf32> to vector<8x32xf32>
    %cst_178 = arith.constant dense<0.000000e+00> : vector<8x32xf32>
    %405 = tpu.matmul %403, %404, %cst_178 {dimension_numbers = #tpu.dot_dimension_numbers<[1], [0], [0], [1], [0, 0, 1, 1], [], []>} : vector<8x8xf32>, vector<8x32xf32>, vector<8x32xf32> -> vector<8x32xf32>
    %406 = tpu.concatenate %364, %405 in 0 : vector<8x32xf32>, vector<8x32xf32> -> vector<16x32xf32>
    %c0_179 = arith.constant 0 : index
    %c0_180 = arith.constant 0 : index
    %407 = vector.load %arg14[%c0_179, %c0_180] : memref<32x32xf32, #tpu.memory_space<vmem>>, vector<32x32xf32>
    %cst_181 = arith.constant dense<0.000000e+00> : vector<16x32xf32>
    %408 = tpu.matmul %406, %407, %cst_181 {dimension_numbers = #tpu.dot_dimension_numbers<[1], [0], [0], [1], [0, 0, 1, 1], [], []>} : vector<16x32xf32>, vector<32x32xf32>, vector<16x32xf32> -> vector<16x32xf32>
    %c0_182 = arith.constant 0 : index
    %c0_183 = arith.constant 0 : index
    %409 = vector.load %arg15[%c0_182, %c0_183] : memref<32x32xf32, #tpu.memory_space<vmem>>, vector<32x32xf32>
    %cst_184 = arith.constant dense<0.000000e+00> : vector<16x32xf32>
    %410 = tpu.matmul %45, %409, %cst_184 {dimension_numbers = #tpu.dot_dimension_numbers<[1], [0], [0], [1], [0, 0, 1, 1], [], []>} : vector<16x32xf32>, vector<32x32xf32>, vector<16x32xf32> -> vector<16x32xf32>
    %411 = arith.addf %408, %410 : vector<16x32xf32>
    %c0_185 = arith.constant 0 : index
    %c0_186 = arith.constant 0 : index
    %412 = vector.load %arg16[%c0_185, %c0_186] : memref<1x32xf32, #tpu.memory_space<vmem>>, vector<1x32xf32>
    %413 = vector.broadcast %412 : vector<1x32xf32> to vector<16x32xf32>
    %414 = arith.addf %411, %413 : vector<16x32xf32>
    %415 = arith.negf %414 : vector<16x32xf32>
    %416 = math.exp %415 : vector<16x32xf32>
    %cst_187 = arith.constant 1.000000e+00 : f32
    %417 = vector.broadcast %cst_187 : f32 to vector<16x32xf32>
    %418 = arith.addf %417, %416 : vector<16x32xf32>
    %419 = arith.divf %417, %418 : vector<16x32xf32>
    %420 = arith.mulf %419, %45 : vector<16x32xf32>
    %cst_188 = arith.constant 1.000000e+00 : f32
    %421 = vector.broadcast %cst_188 : f32 to vector<16x32xf32>
    %422 = arith.subf %421, %419 : vector<16x32xf32>
    %423 = arith.mulf %422, %406 : vector<16x32xf32>
    %424 = arith.addf %420, %423 : vector<16x32xf32>
    %c0_189 = arith.constant 0 : index
    %c0_190 = arith.constant 0 : index
    %425 = vector.load %arg17[%c0_189, %c0_190] : memref<32x32xf32, #tpu.memory_space<vmem>>, vector<32x32xf32>
    %cst_191 = arith.constant dense<0.000000e+00> : vector<16x32xf32>
    %426 = tpu.matmul %424, %425, %cst_191 {dimension_numbers = #tpu.dot_dimension_numbers<[1], [0], [0], [1], [0, 0, 1, 1], [], []>} : vector<16x32xf32>, vector<32x32xf32>, vector<16x32xf32> -> vector<16x32xf32>
    %c0_192 = arith.constant 0 : index
    %c0_193 = arith.constant 0 : index
    %427 = vector.load %arg18[%c0_192, %c0_193] : memref<1x32xf32, #tpu.memory_space<vmem>>, vector<1x32xf32>
    %428 = vector.broadcast %427 : vector<1x32xf32> to vector<16x32xf32>
    %429 = arith.addf %426, %428 : vector<16x32xf32>
    %c0_194 = arith.constant 0 : index
    %c0_195 = arith.constant 0 : index
    %430 = vector.load %arg20[%c0_194, %c0_195] : memref<16x32xf32, #tpu.memory_space<vmem>>, vector<16x32xf32>
    tpu.vector_store %arg20[%c0_194, %c0_195], %429 {strides = array<i32>} : memref<16x32xf32, #tpu.memory_space<vmem>>, vector<16x32xf32>,
    return
  }
}

</mosaic_0001>

<bundles_post_ra>
// kernel: abinet_iter_forward.1
= control target key start
LH: loop header
LB: loop body
LE: loop exit
PB: predicated region body
PF: predicated region fallthrough
CT: control target
= control target key end

     0   :  { %s2920_s0 = inlined_call_operand.vmem [shape: f32[4,512], index: 0, kind: input, shape index: {}]   ;;  %s2921_s1 = inlined_call_operand.vmem [shape: f32[32,4], index: 1, kind: input, shape index: {}]   ;;  %s2922_s2 = inlined_call_operand.vmem [shape: f32[32,1], index: 2, kind: input, shape index: {}]   ;;  %s2923_s3 = inlined_call_operand.vmem [shape: f32[64,32], index: 3, kind: input, shape index: {}]   ;;  %s2924_s4 = inlined_call_operand.vmem [shape: f32[8,32], index: 4, kind: input, shape index: {}]   ;;  %s2925_s5 = inlined_call_operand.vmem [shape: f32[32,32], index: 5, kind: input, shape index: {}]   ;;  %s2926_s6 = inlined_call_operand.vmem [shape: f32[1,32], index: 6, kind: input, shape index: {}, may-alias: {6,13,16,18}]   ;;  %s2927_s7 = inlined_call_operand.vmem [shape: f32[32,32], index: 7, kind: input, shape index: {}]   ;;  %s2928_s8 = inlined_call_operand.vmem [shape: f32[16,32], index: 8, kind: input, shape index: {}]   ;;  %s2929_s9 = inlined_call_operand.vmem [shape: f32[32,32], index: 9, kind: input, shape index: {}]   ;;  %s2930_s10 = inlined_call_operand.vmem [shape: f32[32,32], index: 10, kind: input, shape index: {}]   ;;  %s2931_s11 = inlined_call_operand.vmem [shape: f32[32,32], index: 11, kind: input, shape index: {}]   ;;  %s2932_s12 = inlined_call_operand.vmem [shape: f32[32,32], index: 12, kind: input, shape index: {}]   ;;  %s2933_s13 = inlined_call_operand.vmem [shape: f32[1,32], index: 13, kind: input, shape index: {}, may-alias: {6,13,16,18}]   ;;  %s2934_s14 = inlined_call_operand.vmem [shape: f32[32,32], index: 14, kind: input, shape index: {}]   ;;  %s2935_s15 = inlined_call_operand.vmem [shape: f32[32,32], index: 15, kind: input, shape index: {}]   ;;  %s2936_s16 = inlined_call_operand.vmem [shape: f32[1,32], index: 16, kind: input, shape index: {}, may-alias: {6,13,16,18}]   ;;  %s2937_s17 = inlined_call_operand.vmem [shape: f32[32,32], index: 17, kind: input, shape index: {}]   ;;  %s2938_s18 = inlined_call_operand.vmem [shape: f32[1,32], index: 18, kind: input, shape index: {}, may-alias: {6,13,16,18}]   ;;  %s2939_s19 = inlined_call_operand.hbm [shape: f32[16,32], index: 19, kind: output, shape index: {0}]   ;;  %s2940_s20 = inlined_call_operand.vmem [shape: f32[16,32], index: 20, kind: output, shape index: {1}]   ;;  %s2941_s21 = inlined_call_operand.hbm [shape: f32[16,256], index: 21, kind: output, shape index: {2}]  }
   0x1   :  { %2947 = sst [smem:[#allocation8_spill]] %s2920_s0 }
   0x2   :  { %2948 = sst [smem:[#allocation9_spill]] %s2921_s1 }
   0x3   :  { %2949 = sst [smem:[#allocation10_spill]] %s2922_s2 }
   0x4   :  { %2950 = sst [smem:[#allocation11_spill]] %s2923_s3 }
   0x5   :  { %2951 = sst [smem:[#allocation12_spill]] %s2924_s4 }
   0x6   :  { %2952 = sst [smem:[#allocation13_spill]] %s2925_s5 }
   0x7   :  { %27 = vsyncpa [#allocation3], 0  ;;  %s2953_s2 = sld [smem:[#allocation8_spill]]  ;;  %v2265_v2 = vmov 0  }
   0x8   :  { %2124 = vset.pattern.permute.xlu1 %v2265_v2  ;;  %s2954_s28 = sld [smem:[#allocation10_spill]]  ;;  %2123 = vset.pattern.permute.xlu0 %v2265_v2 }
   0x9   :  { %2125 = vset.pattern.permute.xlu2 %v2265_v2 }
   0xd   :  { %v71_v0 = vld [vmem:[%s2953_s2] sm:$0xff]  ;;  %v72_v1 = vld [vmem:[%s2953_s2 + $0x8] sm:$0xff] }
   0xe   :  { %99 = vst [vmem:[#allocation1] ss:$2 sm:$0xff] %v71_v0  ;;  %v74_v3 = vld [vmem:[%s2954_s28 + $0x8] sm:$0xff]  ;;  %v76_v4 = vld [vmem:[%s2954_s28 + $0x18] sm:$0xff] }
   0xf   :  { %101 = vst [vmem:[#allocation1 + $0x10] ss:$2 sm:$0xff] %v72_v1  ;;  %84 = vperm.xlu1 %2124, %v74_v3   ;;  %94 = vperm.xlu0 %2123, %v76_v4  }
  0x10   :  { %28 = vsyncpa [#allocation5], 0  ;;  %vm119_vm0 = vcmask 1043456   ;;  %s2955_s5 = sld [smem:[#allocation9_spill]]  ;;  %vm106_vm1 = vcmask 31744   ;;  %v73_v10 = vld [vmem:[%s2954_s28] sm:$0xff] }
  0x11   :  { %v75_v11 = vld [vmem:[%s2954_s28 + $0x10] sm:$0xff]  ;;  %vm268_vm2 = vcmask 261120   ;;  %s2956_s29 = sld [smem:[#allocation11_spill]]  ;;  %vm846_vm4 = vcmask 7168   ;;  %s1962_s2 = sshll.u32 %s2939_s19, 4  ;;  %s1963_s2 = int_to_ptr.hbm [resolvable:$true] %s1962_s2 }
  0x12   :  { %s2958_s30 = sld [smem:[#allocation13_spill]]  ;;  %s2269_s25 = smov [#allocation4]  }
  0x13   :  { %s1977_s3 = sshll.u32 %s2941_s21, 4  ;;  %s2270_s28 = smov 256   ;;  %s1978_s3 = int_to_ptr.hbm [resolvable:$true] %s1977_s3 }
  0x15   :  { %v102_v6 = vld.sshfl [vmem:[#allocation1] sm:$0xff pattern:$0x75316420]  ;;  %v103_v7 = vld.sshfl [vmem:[#allocation1 + $0x8] sm:$0xff pattern:$0x75316420] }
  0x16   :  { %v67_v5 = vld [vmem:[%s2955_s5] sm:$0xff]  ;;  %1996 = vmatpush.msk.msra.mxu0 %vm119_vm0, %v102_v6  ;;  %2001 = vmatpush.msk.msra.mxu1 %vm119_vm0, %v103_v7  ;;  %v104_v8 = vld.sshfl [vmem:[#allocation1 + $0x10] sm:$0xff pattern:$0x75316420]  ;;  %v68_v12 = vld [vmem:[%s2955_s5 + $0x8] sm:$0xff] }
  0x17   :  { %v105_v9 = vld.sshfl [vmem:[#allocation1 + $0x18] sm:$0xff pattern:$0x75316420]  ;;  %2006 = vmatpush.msk.msra.mxu2 %vm119_vm0, %v104_v8  ;;  %1997 = vmatmul.msk.f32.vlgmr.msra.gmra.mxu0 %vm106_vm1, %v67_v5  ;;  %v69_v13 = vld [vmem:[%s2955_s5 + $0x10] sm:$0xff]  ;;  %v260_v59 = vld [vmem:[%s2956_s29] sm:$0xff] }
  0x18   :  { %2011 = vmatpush.msk.msra.mxu3 %vm119_vm0, %v105_v9  ;;  %2002 = vmatmul.msk.f32.vlgmr.msra.gmra.mxu1 %vm106_vm1, %v67_v5  ;;  %v70_v14 = vld [vmem:[%s2955_s5 + $0x18] sm:$0xff]  ;;  %v261_v4 = vld [vmem:[%s2956_s29 + $0x8] sm:$0xff]  ;;  %v264_v7 = vld [vmem:[%s2956_s29 + $0x20] sm:$0xff]  ;;  %vm896_vm0 = vcmask 64512  }
  0x19   :  { %2007 = vmatmul.msk.f32.vlgmr.msra.gmra.mxu2 %vm106_vm1, %v67_v5  ;;  %2012 = vmatmul.msk.f32.vlgmr.msra.gmra.mxu3 %vm106_vm1, %v67_v5  ;;  %v262_v5 = vld [vmem:[%s2956_s29 + $0x10] sm:$0xff]  ;;  %v263_v6 = vld [vmem:[%s2956_s29 + $0x18] sm:$0xff]  ;;  %v265_v8 = vld [vmem:[%s2956_s29 + $0x28] sm:$0xff] }
  0x1a   :  { %79 = vperm.xlu1 %2124, %v73_v10   ;;  %89 = vperm.xlu0 %2123, %v75_v11   ;;  %v266_v9 = vld [vmem:[%s2956_s29 + $0x30] sm:$0xff]  ;;  %v267_v10 = vld [vmem:[%s2956_s29 + $0x38] sm:$0xff]  ;;  %s2957_s29 = sld [smem:[#allocation12_spill]] }
  0x1f   :  { %1998 = vmatmul.msk.f32.gmra.mxu0 %vm106_vm1, %v68_v12 }
  0x20   :  { %2003 = vmatmul.msk.f32.gmra.mxu1 %vm106_vm1, %v68_v12 }
  0x21   :  { %2008 = vmatmul.msk.f32.gmra.mxu2 %vm106_vm1, %v68_v12  ;;  %2013 = vmatmul.msk.f32.gmra.mxu3 %vm106_vm1, %v68_v12 }
  0x27   :  { %1999 = vmatmul.msk.f32.gmra.mxu0 %vm106_vm1, %v69_v13 }
  0x28   :  { %2004 = vmatmul.msk.f32.gmra.mxu1 %vm106_vm1, %v69_v13 }
  0x29   :  { %2009 = vmatmul.msk.f32.gmra.mxu2 %vm106_vm1, %v69_v13  ;;  %2014 = vmatmul.msk.f32.gmra.mxu3 %vm106_vm1, %v69_v13 }
  0x2f   :  { %2000 = vmatmul.msk.f32.gmra.mxu0 %vm106_vm1, %v70_v14 }
  0x30   :  { %2005 = vmatmul.msk.f32.gmra.mxu1 %vm106_vm1, %v70_v14 }
  0x31   :  { %2010 = vmatmul.msk.f32.gmra.mxu2 %vm106_vm1, %v70_v14  ;;  %2015 = vmatmul.msk.f32.gmra.mxu3 %vm106_vm1, %v70_v14 }
  0x81   :  { %v95_v21 = vpop.permute.xlu0 %94  ;;  %v85_v22 = vpop.permute.xlu1 %84 }
  0x8c   :  { %v90_v27 = vpop.permute.xlu0 %89  ;;  %v80_v36 = vpop.permute.xlu1 %79 }
  0x94   :  { %v145_v15 = vpop.f32.mrf.mxu0 }
  0x95   :  { %v174_v16 = vpop.f32.mrf.mxu1  ;;  %v146_v41 = vadd.f32 %v145_v15, %v80_v36 }
  0x96   :  { %v175_v42 = vadd.f32 %v174_v16, %v80_v36 }
  0x97   :  { %v244_v53 = vmax.f32 %v146_v41, 0.0 }
  0x98   :  { %v245_v54 = vmax.f32 %v175_v42, 0.0 }
  0x9c   :  { %v203_v17 = vpop.f32.mrf.mxu2  ;;  %v232_v18 = vpop.f32.mrf.mxu3 }
  0x9d   :  { %v148_v19 = vpop.f32.mrf.mxu0  ;;  %v177_v20 = vpop.f32.mrf.mxu1  ;;  %v204_v60 = vadd.f32 %v203_v17, %v80_v36  ;;  %v233_v61 = vadd.f32 %v232_v18, %v80_v36 }
  0x9e   :  { %v149_v37 = vadd.f32 %v148_v19, %v85_v22  ;;  %v178_v38 = vadd.f32 %v177_v20, %v85_v22 }
  0x9f   :  { %v246_v2 = vmax.f32 %v204_v60, 0.0  ;;  %v247_v3 = vmax.f32 %v233_v61, 0.0 }
  0xa0   :  { %v248_v47 = vmax.f32 %v149_v37, 0.0  ;;  %v249_v48 = vmax.f32 %v178_v38, 0.0 }
  0xa4   :  { %v206_v23 = vpop.f32.mrf.mxu2  ;;  %v235_v24 = vpop.f32.mrf.mxu3 }
  0xa5   :  { %v151_v25 = vpop.f32.mrf.mxu0  ;;  %v180_v26 = vpop.f32.mrf.mxu1  ;;  %v207_v55 = vadd.f32 %v206_v23, %v85_v22  ;;  %v236_v56 = vadd.f32 %v235_v24, %v85_v22 }
  0xa6   :  { %v152_v32 = vadd.f32 %v151_v25, %v90_v27  ;;  %v181_v33 = vadd.f32 %v180_v26, %v90_v27  ;;  %v457_v25 = vld [vmem:[%s2957_s29] sm:$0xff]  ;;  %s2271_s29 = smov 16  }
  0xa7   :  { %v250_v0 = vmax.f32 %v207_v55, 0.0  ;;  %v251_v1 = vmax.f32 %v236_v56, 0.0 }
  0xa8   :  { %v252_v43 = vmax.f32 %v152_v32, 0.0  ;;  %v253_v44 = vmax.f32 %v181_v33, 0.0 }
  0xac   :  { %v209_v28 = vpop.f32.mrf.mxu2  ;;  %v238_v29 = vpop.f32.mrf.mxu3 }
  0xad   :  { %v154_v30 = vpop.f32.mrf.mxu0  ;;  %v183_v31 = vpop.f32.mrf.mxu1  ;;  %v210_v49 = vadd.f32 %v209_v28, %v90_v27  ;;  %v239_v50 = vadd.f32 %v238_v29, %v90_v27 }
  0xae   :  { %v155_v34 = vadd.f32 %v154_v30, %v95_v21  ;;  %v184_v35 = vadd.f32 %v183_v31, %v95_v21 }
  0xaf   :  { %v254_v62 = vmax.f32 %v210_v49, 0.0  ;;  %v255_v63 = vmax.f32 %v239_v50, 0.0 }
  0xb0   :  { %v256_v39 = vmax.f32 %v155_v34, 0.0  ;;  %v257_v40 = vmax.f32 %v184_v35, 0.0 }
  0xb2   :  { %305 = vmatpush.msrb.mxu0 %v256_v39  ;;  %346 = vmatpush.msrb.mxu1 %v257_v40 }
  0xb4   :  { %v212_v45 = vpop.f32.mrf.mxu2  ;;  %v241_v46 = vpop.f32.mrf.mxu3  ;;  %306 = vmatpush.msrb.mxu0 %v252_v43  ;;  %347 = vmatpush.msrb.mxu1 %v253_v44 }
  0xb5   :  { %v213_v51 = vadd.f32 %v212_v45, %v95_v21  ;;  %v242_v52 = vadd.f32 %v241_v46, %v95_v21 }
  0xb6   :  { %307 = vmatpush.msrb.mxu0 %v248_v47  ;;  %348 = vmatpush.msrb.mxu1 %v249_v48 }
  0xb7   :  { %v258_v57 = vmax.f32 %v213_v51, 0.0  ;;  %v259_v58 = vmax.f32 %v242_v52, 0.0 }
  0xb8   :  { %308 = vmatpush.msrb.mxu0 %v244_v53  ;;  %349 = vmatpush.msrb.mxu1 %v245_v54 }
  0xb9   :  { %387 = vmatpush.msrb.mxu2 %v258_v57  ;;  %428 = vmatpush.msrb.mxu3 %v259_v58 }
  0xba   :  { %2016 = vmatmul.msk.f32.vlgmr.msrb.gmra.mxu0 %vm268_vm2, %v260_v59  ;;  %2024 = vmatmul.msk.f32.vlgmr.msrb.gmra.mxu1 %vm268_vm2, %v260_v59 }
  0xbb   :  { %388 = vmatpush.msrb.mxu2 %v254_v62  ;;  %429 = vmatpush.msrb.mxu3 %v255_v63 }
  0xbd   :  { %389 = vmatpush.msrb.mxu2 %v250_v0  ;;  %430 = vmatpush.msrb.mxu3 %v251_v1 }
  0xbf   :  { %390 = vmatpush.msrb.mxu2 %v246_v2  ;;  %431 = vmatpush.msrb.mxu3 %v247_v3 }
  0xc0   :  { %2032 = vmatmul.msk.f32.vlgmr.msrb.gmra.mxu2 %vm268_vm2, %v260_v59  ;;  %2040 = vmatmul.msk.f32.vlgmr.msrb.gmra.mxu3 %vm268_vm2, %v260_v59 }
  0xc2   :  { %2017 = vmatmul.msk.f32.gmra.mxu0 %vm268_vm2, %v261_v4  ;;  %2025 = vmatmul.msk.f32.gmra.mxu1 %vm268_vm2, %v261_v4 }
  0xc8   :  { %2033 = vmatmul.msk.f32.gmra.mxu2 %vm268_vm2, %v261_v4  ;;  %2041 = vmatmul.msk.f32.gmra.mxu3 %vm268_vm2, %v261_v4 }
  0xca   :  { %2018 = vmatmul.msk.f32.gmra.mxu0 %vm268_vm2, %v262_v5  ;;  %2026 = vmatmul.msk.f32.gmra.mxu1 %vm268_vm2, %v262_v5 }
  0xd0   :  { %2034 = vmatmul.msk.f32.gmra.mxu2 %vm268_vm2, %v262_v5  ;;  %2042 = vmatmul.msk.f32.gmra.mxu3 %vm268_vm2, %v262_v5 }
  0xd2   :  { %2019 = vmatmul.msk.f32.gmra.mxu0 %vm268_vm2, %v263_v6  ;;  %2027 = vmatmul.msk.f32.gmra.mxu1 %vm268_vm2, %v263_v6 }
  0xd8   :  { %2035 = vmatmul.msk.f32.gmra.mxu2 %vm268_vm2, %v263_v6  ;;  %2043 = vmatmul.msk.f32.gmra.mxu3 %vm268_vm2, %v263_v6  ;;  %v662_v6 = vld [vmem:[%s2958_s30 + $0x18] sm:$0xff] }
  0xda   :  { %2020 = vmatmul.msk.f32.gmra.mxu0 %vm268_vm2, %v264_v7  ;;  %2028 = vmatmul.msk.f32.gmra.mxu1 %vm268_vm2, %v264_v7 }
  0xe0   :  { %2036 = vmatmul.msk.f32.gmra.mxu2 %vm268_vm2, %v264_v7  ;;  %2044 = vmatmul.msk.f32.gmra.mxu3 %vm268_vm2, %v264_v7  ;;  %v661_v7 = vld [vmem:[%s2958_s30 + $0x10] sm:$0xff] }
  0xe2   :  { %2021 = vmatmul.msk.f32.gmra.mxu0 %vm268_vm2, %v265_v8  ;;  %2029 = vmatmul.msk.f32.gmra.mxu1 %vm268_vm2, %v265_v8 }
  0xe8   :  { %2037 = vmatmul.msk.f32.gmra.mxu2 %vm268_vm2, %v265_v8  ;;  %2045 = vmatmul.msk.f32.gmra.mxu3 %vm268_vm2, %v265_v8 }
  0xea   :  { %2022 = vmatmul.msk.f32.gmra.mxu0 %vm268_vm2, %v266_v9  ;;  %2030 = vmatmul.msk.f32.gmra.mxu1 %vm268_vm2, %v266_v9 }
  0xf0   :  { %2038 = vmatmul.msk.f32.gmra.mxu2 %vm268_vm2, %v266_v9  ;;  %2046 = vmatmul.msk.f32.gmra.mxu3 %vm268_vm2, %v266_v9 }
  0xf2   :  { %2023 = vmatmul.msk.f32.gmra.mxu0 %vm268_vm2, %v267_v10  ;;  %2031 = vmatmul.msk.f32.gmra.mxu1 %vm268_vm2, %v267_v10 }
  0xf8   :  { %2039 = vmatmul.msk.f32.gmra.mxu2 %vm268_vm2, %v267_v10  ;;  %2047 = vmatmul.msk.f32.gmra.mxu3 %vm268_vm2, %v267_v10 }
 0x137   :  { %v310_v11 = vpop.f32.mrf.mxu0  ;;  %v351_v12 = vpop.f32.mrf.mxu1 }
 0x13f   :  { %v313_v13 = vpop.f32.mrf.mxu0  ;;  %v354_v14 = vpop.f32.mrf.mxu1 }
 0x143   :  { %v392_v15 = vpop.f32.mrf.mxu2  ;;  %v433_v16 = vpop.f32.mrf.mxu3 }
 0x147   :  { %v316_v17 = vpop.f32.mrf.mxu0  ;;  %v357_v18 = vpop.f32.mrf.mxu1 }
 0x14b   :  { %v395_v19 = vpop.f32.mrf.mxu2  ;;  %v436_v20 = vpop.f32.mrf.mxu3 }
 0x14f   :  { %v319_v21 = vpop.f32.mrf.mxu0  ;;  %v360_v22 = vpop.f32.mrf.mxu1 }
 0x150   :  { %473 = vmatpush.msra.mxu0 %v319_v21  ;;  %493 = vmatpush.msra.mxu1 %v360_v22 }
 0x152   :  { %474 = vmatpush.msra.mxu0 %v316_v17  ;;  %494 = vmatpush.msra.mxu1 %v357_v18  ;;  %v659_v17 = vld [vmem:[%s2958_s30] sm:$0xff] }
 0x153   :  { %v398_v23 = vpop.f32.mrf.mxu2  ;;  %v439_v24 = vpop.f32.mrf.mxu3 }
 0x154   :  { %475 = vmatpush.msra.mxu0 %v313_v13  ;;  %495 = vmatpush.msra.mxu1 %v354_v14 }
 0x156   :  { %476 = vmatpush.msra.mxu0 %v310_v11  ;;  %496 = vmatpush.msra.mxu1 %v351_v12 }
 0x157   :  { %2048 = vmatmul.msk.f32.vlgmr.msra.gmra.mxu0 %vm268_vm2, %v457_v25  ;;  %2049 = vmatmul.msk.f32.vlgmr.msra.gmra.mxu1 %vm268_vm2, %v457_v25  ;;  %v322_v28 = vpop.f32.mrf.mxu0  ;;  %v363_v29 = vpop.f32.mrf.mxu1 }
 0x15b   :  { %v401_v26 = vpop.f32.mrf.mxu2  ;;  %v442_v27 = vpop.f32.mrf.mxu3 }
 0x15c   :  { %572 = vmatpush.msrb.mxu0 %v401_v26  ;;  %592 = vmatpush.msrb.mxu1 %v442_v27 }
 0x15e   :  { %573 = vmatpush.msrb.mxu0 %v398_v23  ;;  %593 = vmatpush.msrb.mxu1 %v439_v24  ;;  %v2126_v24 = vld [vmem:[%s2926_s6] ss:$0 sm:$0xff]  ;;  %s2267_s6 = smov 128  }
 0x15f   :  { %v325_v30 = vpop.f32.mrf.mxu0  ;;  %v366_v31 = vpop.f32.mrf.mxu1 }
 0x160   :  { %574 = vmatpush.msrb.mxu0 %v395_v19  ;;  %594 = vmatpush.msrb.mxu1 %v436_v20 }
 0x162   :  { %575 = vmatpush.msrb.mxu0 %v392_v15  ;;  %595 = vmatpush.msrb.mxu1 %v433_v16  ;;  %v660_v16 = vld [vmem:[%s2958_s30 + $0x8] sm:$0xff] }
 0x163   :  { %2050 = vmatmul.msk.f32.vlgmr.msrb.gmra.mxu0 %vm268_vm2, %v457_v25  ;;  %2051 = vmatmul.msk.f32.vlgmr.msrb.gmra.mxu1 %vm268_vm2, %v457_v25  ;;  %v404_v62 = vpop.f32.mrf.mxu2  ;;  %v445_v63 = vpop.f32.mrf.mxu3 }
 0x164   :  { %685 = vmatpush.msra.mxu0 %v662_v6  ;;  %v2574_v6 = vld [vmem:[%s2929_s9 + $0x10] sm:$0xff] }
 0x166   :  { %686 = vmatpush.msra.mxu0 %v661_v7  ;;  %v2579_v7 = vld [vmem:[%s2930_s10 + $0x10] sm:$0xff] }
 0x167   :  { %v328_v32 = vpop.f32.mrf.mxu0  ;;  %v369_v33 = vpop.f32.mrf.mxu1 }
 0x168   :  { %687 = vmatpush.msra.mxu0 %v660_v16  ;;  %v2601_v16 = vld [vmem:[%s2930_s10 + $0x8] sm:$0xff] }
 0x16a   :  { %688 = vmatpush.msra.mxu0 %v659_v17  ;;  %v2606_v17 = vld [vmem:[%s2931_s11 + $0x8] sm:$0xff] }
 0x16b   :  { %v407_v0 = vpop.f32.mrf.mxu2  ;;  %v448_v1 = vpop.f32.mrf.mxu3 }
 0x16f   :  { %v331_v34 = vpop.f32.mrf.mxu0  ;;  %v372_v35 = vpop.f32.mrf.mxu1 }
 0x170   :  { %532 = vmatpush.xpose.msra.mxu2 %v331_v34  ;;  %552 = vmatpush.xpose.msra.mxu3 %v372_v35 }
 0x173   :  { %v410_v2 = vpop.f32.mrf.mxu2  ;;  %v451_v3 = vpop.f32.mrf.mxu3 }
 0x174   :  { %533 = vmatpush.xpose.msra.mxu2 %v328_v32  ;;  %553 = vmatpush.xpose.msra.mxu3 %v369_v33 }
 0x178   :  { %534 = vmatpush.xpose.msra.mxu2 %v325_v30  ;;  %554 = vmatpush.xpose.msra.mxu3 %v366_v31  ;;  %v843_v31 = vlaneseq }
 0x17a   :  { %v2519_v35 = vshrl.u32 %v843_v31, 7 }
 0x17b   :  { %v413_v4 = vpop.f32.mrf.mxu2  ;;  %v454_v5 = vpop.f32.mrf.mxu3 }
 0x17c   :  { %535 = vmatpush.xpose.msra.mxu2 %v322_v28  ;;  %555 = vmatpush.xpose.msra.mxu3 %v363_v29 }
 0x180   :  { %631 = vmatpush.xpose.msrb.mxu2 %v413_v4  ;;  %651 = vmatpush.xpose.msrb.mxu3 %v454_v5  ;;  %v2562_v4 = vld [vmem:[%s2930_s10 + $0x18] sm:$0xff] }
 0x181   :  { %v2567_v5 = vld [vmem:[%s2931_s11 + $0x18] sm:$0xff] }
 0x182   :  { %831 = vmatpush.msrb.mxu0 %v2567_v5 }
 0x184   :  { %632 = vmatpush.xpose.msrb.mxu2 %v410_v2  ;;  %652 = vmatpush.xpose.msrb.mxu3 %v451_v3  ;;  %v2551_v2 = vld [vmem:[%s2927_s7] sm:$0xff]  ;;  %v2557_v3 = vld [vmem:[%s2929_s9 + $0x18] sm:$0xff] }
 0x188   :  { %633 = vmatpush.xpose.msrb.mxu2 %v407_v0  ;;  %653 = vmatpush.xpose.msrb.mxu3 %v448_v1  ;;  %v2539_v0 = vld [vmem:[%s2927_s7 + $0x10] sm:$0xff]  ;;  %v2545_v1 = vld [vmem:[%s2927_s7 + $0x8] sm:$0xff] }
 0x18c   :  { %634 = vmatpush.xpose.msrb.mxu2 %v404_v62  ;;  %654 = vmatpush.xpose.msrb.mxu3 %v445_v63  ;;  %v2533_v63 = vld [vmem:[%s2927_s7 + $0x18] sm:$0xff] }
 0x18d   :  { %744 = vmatpush.msra.mxu1 %v2533_v63 }
 0x18f   :  { %745 = vmatpush.msra.mxu1 %v2539_v0 }
 0x191   :  { %746 = vmatpush.msra.mxu1 %v2545_v1 }
 0x193   :  { %747 = vmatpush.msra.mxu1 %v2551_v2 }
 0x1d4   :  { %v478_v36 = vpop.f32.mrf.mxu0  ;;  %v498_v37 = vpop.f32.mrf.mxu1 }
 0x1d5   :  { %v501_v38 = vmul.f32 0.17677669, %v478_v36  ;;  %v502_v39 = vmul.f32 0.17677669, %v498_v37 }
 0x1d7   :  { %v503_v40 = vmax.f32 %v501_v38, %v502_v39 }
 0x1d9   :  { %504 = vmax.xlane.f32.xlu2 %v503_v40 }
 0x1e0   :  { %v577_v41 = vpop.f32.mrf.mxu0  ;;  %v597_v42 = vpop.f32.mrf.mxu1 }
 0x1e1   :  { %v600_v43 = vmul.f32 0.17677669, %v577_v41  ;;  %v601_v44 = vmul.f32 0.17677669, %v597_v42 }
 0x1e3   :  { %v602_v45 = vmax.f32 %v600_v43, %v601_v44 }
 0x1e5   :  { %603 = vmax.xlane.f32.xlu2 %v602_v45 }
 0x24c   :  { %v505_v46 = vpop.xlane.xlu2 %504 }
 0x24d   :  { %v506_v47 = vsub.f32 %v501_v38, %v505_v46  ;;  %v507_v48 = vsub.f32 %v502_v39, %v505_v46 }
 0x24f   :  { %v508_v49 = vmul.f32 1.442695, %v506_v47  ;;  %v510_v50 = vmul.f32 1.442695, %v507_v48 }
 0x251   :  { %2129 = vpow2.f32 %v508_v49 }
 0x252   :  { %2131 = vpow2.f32 %v510_v50 }
 0x257   :  { %v2130_v51 = vpop.eup %2129 }
 0x258   :  { %v2132_v52 = vpop.eup %2131  ;;  %v604_v53 = vpop.xlane.xlu2 %603 }
 0x259   :  { %v605_v54 = vsub.f32 %v600_v43, %v604_v53  ;;  %v606_v55 = vsub.f32 %v601_v44, %v604_v53  ;;  %v512_v56 = vadd.f32 %v2132_v52, %v2130_v51 }
 0x25b   :  { %v607_v57 = vmul.f32 1.442695, %v605_v54  ;;  %v609_v58 = vmul.f32 1.442695, %v606_v55  ;;  %513 = vadd.xlane.f32.xlu0 %v512_v56 }
 0x25d   :  { %2133 = vpow2.f32 %v607_v57 }
 0x25e   :  { %2135 = vpow2.f32 %v609_v58 }
 0x263   :  { %v2134_v59 = vpop.eup %2133 }
 0x264   :  { %v2136_v60 = vpop.eup %2135 }
 0x265   :  { %v611_v61 = vadd.f32 %v2136_v60, %v2134_v59 }
 0x267   :  { %612 = vadd.xlane.f32.xlu1 %v611_v61 }
 0x2ce   :  { %v514_v8 = vpop.xlane.xlu0 %513 }
 0x2cf   :  { %2137 = vrcp.f32 %v514_v8  ;;  %v2584_v8 = vld [vmem:[%s2931_s11 + $0x10] sm:$0xff] }
 0x2d0   :  { %832 = vmatpush.msrb.mxu0 %v2584_v8 }
 0x2d2   :  { %833 = vmatpush.msrb.mxu0 %v2606_v17 }
 0x2d5   :  { %v2138_v9 = vpop.eup %2137 }
 0x2d6   :  { %v516_v10 = vmul.f32 %v2138_v9, %v2130_v51  ;;  %v517_v11 = vmul.f32 %v2138_v9, %v2132_v52 }
 0x2d8   :  { %518 = vst [vmem:[#allocation4] sm:$0xff] %v516_v10  ;;  %536 = vmatmul.f32.vlgmr.msra.gmra.mxu2 %v516_v10  ;;  %556 = vmatmul.f32.vlgmr.msra.gmra.mxu3 %v517_v11 }
 0x2d9   :  { %519 = vst [vmem:[#allocation4 + $0x8] sm:$0xff] %v517_v11  ;;  %777 = vmatpush.msra.mxu2 %v2557_v3  ;;  %804 = vmatpush.msra.mxu3 %v2562_v4 }
 0x2da   :  { %v613_v12 = vpop.xlane.xlu1 %612 }
 0x2db   :  { %2139 = vrcp.f32 %v613_v12  ;;  %778 = vmatpush.msra.mxu2 %v2574_v6  ;;  %805 = vmatpush.msra.mxu3 %v2579_v7 }
 0x2dd   :  { %806 = vmatpush.msra.mxu3 %v2601_v16 }
 0x2e1   :  { %v2140_v13 = vpop.eup %2139 }
 0x2e2   :  { %v615_v14 = vmul.f32 %v2140_v13, %v2134_v59  ;;  %v616_v15 = vmul.f32 %v2140_v13, %v2136_v60 }
 0x2e4   :  { %617 = vst [vmem:[#allocation4 + $0x10] sm:$0xff] %v615_v14  ;;  %635 = vmatmul.f32.vlgmr.msrb.gmra.mxu2 %v615_v14  ;;  %655 = vmatmul.f32.vlgmr.msrb.gmra.mxu3 %v616_v15 }
 0x2e5   :  { %618 = vst [vmem:[#allocation4 + $0x18] sm:$0xff] %v616_v15  ;;  %v2596_v15 = vld [vmem:[%s2929_s9 + $0x8] sm:$0xff] }
 0x2e6   :  { %779 = vmatpush.msra.mxu2 %v2596_v15 }
 0x35b   :  { %v537_v18 = vpop.f32.mrf.mxu2  ;;  %v557_v19 = vpop.f32.mrf.mxu3 }
 0x35c   :  { %v2503_v20 = vadd.f32 %v557_v19, %v537_v18  ;;  %v2613_v18 = vld [vmem:[%s2929_s9] sm:$0xff] }
 0x35d   :  { %v2618_v19 = vld [vmem:[%s2930_s10] sm:$0xff]  ;;  %780 = vmatpush.msra.mxu2 %v2613_v18 }
 0x35e   :  { %2052 = vmatmul.msk.f32.vlgmr.msra.gmra.mxu0 %vm268_vm2, %v2503_v20  ;;  %807 = vmatpush.msra.mxu3 %v2618_v19 }
 0x367   :  { %v636_v21 = vpop.f32.mrf.mxu2  ;;  %v656_v22 = vpop.f32.mrf.mxu3 }
 0x368   :  { %v2507_v23 = vadd.f32 %v656_v22, %v636_v21  ;;  %v2623_v21 = vld [vmem:[%s2931_s11] sm:$0xff]  ;;  %v1020_v22 = vld [vmem:[%s2935_s15 + $0x18] sm:$0xff] }
 0x369   :  { %834 = vmatpush.msrb.mxu0 %v2623_v21 }
 0x36a   :  { %2053 = vmatmul.msk.f32.gmra.mxu0 %vm268_vm2, %v2507_v23 }
 0x36b   :  { %1033 = vmatpush.msra.mxu0 %v1020_v22 }
 0x3db   :  { %v690_v25 = vpop.f32.mrf.mxu0 }
 0x3dc   :  { %v691_v26 = vadd.f32 %v2126_v24, %v690_v25  ;;  %v1018_v25 = vld [vmem:[%s2935_s15 + $0x8] sm:$0xff] }
 0x3de   :  { %696 = vst.msk [vmem:[#allocation2] sm:$0xff] %vm268_vm2, %v691_v26  ;;  %v698_v27 = vsel %vm268_vm2, %v691_v26, -inf }
 0x3df   :  { %699 = vmax.xlane.f32.xlu2 %v698_v27  ;;  %v2644_v27 = vld [vmem:[%s2928_s8] sm:$0xff] }
 0x3e7   :  { %v693_v28 = vpop.f32.mrf.mxu0 }
 0x3e8   :  { %v694_v29 = vadd.f32 %v2126_v24, %v693_v28  ;;  %v1019_v24 = vld [vmem:[%s2935_s15 + $0x10] sm:$0xff] }
 0x3e9   :  { %1034 = vmatpush.msra.mxu0 %v1019_v24 }
 0x3ea   :  { %697 = vst.msk [vmem:[#allocation2 + $0x8] sm:$0xff] %vm268_vm2, %v694_v29  ;;  %v701_v30 = vsel %vm268_vm2, %v694_v29, -inf }
 0x3eb   :  { %702 = vmax.xlane.f32.xlu2 %v701_v30  ;;  %1035 = vmatpush.msra.mxu0 %v1018_v25  ;;  %v2656_v30 = vld [vmem:[%s2928_s8 + $0x8] sm:$0xff]  ;;  %v2717_v25 = vld [vmem:[%s2934_s14] sm:$0xff]  ;;  %s1975_s8 = sshll.u32 %s2269_s25, 4  ;;  %s1976_s8 = int_to_ptr.vmem [resolvable:$true] %s1975_s8 }
 0x3ec   :  { %1983 = dma.vmem_to_hbm [thread:$0]  %s1976_s8, 512, %s1978_s3, [#allocation5], %s2270_s28, %s2270_s28, %s2271_s29  }
 0x452   :  { %v700_v32 = vpop.xlane.xlu2 %699 }
 0x453   :  { %v704_v33 = vsub.f32 %v691_v26, %v700_v32  ;;  %vm842_vm3 = vcmp.ge.f32.partialorder %v691_v26, %v700_v32  ;;  %v1017_v26 = vld [vmem:[%s2935_s15] sm:$0xff]  ;;  %s2268_s15 = smov 8  }
 0x454   :  { %v845_v36 = vsel %vm842_vm3, %v2519_v35, 8  ;;  %1036 = vmatpush.msra.mxu0 %v1017_v26 }
 0x455   :  { %v706_v34 = vmul.f32 1.442695, %v704_v33  ;;  %v847_v38 = vsel %vm846_vm4, %v845_v36, 2147483647 }
 0x456   :  { %v848_v42 = vrot.slane %v847_v38, 4 }
 0x457   :  { %2141 = vpow2.f32 %v706_v34 }
 0x458   :  { %vm849_vm6 = vcmp.lt.s32.totalorder %v847_v38, %v848_v42 }
 0x459   :  { %v850_v49 = vsel %vm849_vm6, %v847_v38, %v848_v42  ;;  %v2676_v42 = vand.u32 127, %v843_v31 }
 0x45a   :  { %v851_v52 = vrot.slane %v850_v49, 2 }
 0x45b   :  { %vm2681_vm15 = vcmp.ne.s32.totalorder %v2676_v42, %v2519_v35 }
 0x45c   :  { %vm852_vm11 = vcmp.lt.s32.totalorder %v850_v49, %v851_v52 }
 0x45d   :  { %v2522_v37 = vpop.eup %2141  ;;  %v853_v58 = vsel %vm852_vm11, %v850_v49, %v851_v52 }
 0x45e   :  { %v703_v39 = vpop.xlane.xlu2 %702  ;;  %v710_v40 = vsel %vm268_vm2, %v2522_v37, 0.0  ;;  %v854_v59 = vrot.slane %v853_v58, 1 }
 0x45f   :  { %v705_v41 = vsub.f32 %v694_v29, %v703_v39  ;;  %vm931_vm5 = vcmp.ge.f32.partialorder %v694_v29, %v703_v39  ;;  %711 = vadd.xlane.f32.xlu2 %v710_v40 }
 0x460   :  { %v932_v43 = vsel %vm931_vm5, %v2519_v35, 8  ;;  %vm855_vm12 = vcmp.lt.s32.totalorder %v853_v58, %v854_v59 }
 0x461   :  { %v708_v44 = vmul.f32 1.442695, %v705_v41  ;;  %v933_v45 = vsel %vm846_vm4, %v932_v43, 2147483647  ;;  %v856_v60 = vsel %vm855_vm12, %v853_v58, %v854_v59 }
 0x462   :  { %v934_v46 = vrot.slane %v933_v45, 4  ;;  %v858_v61 = vadd.s32 1, %v856_v60  ;;  %vm857_vm13 = vcmp.lt.s32.totalorder %v856_v60, 8 }
 0x463   :  { %2143 = vpow2.f32 %v708_v44 }
 0x464   :  { %vm935_vm7 = vcmp.lt.s32.totalorder %v933_v45, %v934_v46  ;;  %v859_v62 = vsel %vm857_vm13, %v858_v61, 8 }
 0x465   :  { %v936_v47 = vsel %vm935_vm7, %v933_v45, %v934_v46 }
 0x466   :  { %v937_v48 = vrot.slane %v936_v47, 2 }
 0x468   :  { %vm938_vm8 = vcmp.lt.s32.totalorder %v936_v47, %v937_v48 }
 0x469   :  { %v2144_v50 = vpop.eup %2143  ;;  %v939_v51 = vsel %vm938_vm8, %v936_v47, %v937_v48 }
 0x46a   :  { %v713_v53 = vsel %vm268_vm2, %v2144_v50, 0.0  ;;  %v940_v54 = vrot.slane %v939_v51, 1 }
 0x46b   :  { %714 = vadd.xlane.f32.xlu2 %v713_v53 }
 0x46c   :  { %vm941_vm9 = vcmp.lt.s32.totalorder %v939_v51, %v940_v54 }
 0x46d   :  { %v942_v55 = vsel %vm941_vm9, %v939_v51, %v940_v54 }
 0x46e   :  { %vm943_vm10 = vcmp.lt.s32.totalorder %v942_v55, 8  ;;  %v944_v56 = vadd.s32 1, %v942_v55 }
 0x470   :  { %v945_v57 = vsel %vm943_vm10, %v944_v56, 8 }
 0x471   :  { %974 = vperm.xlu0 %2123, %v945_v57  }
 0x483   :  { %890 = vperm.xlu2 %2125, %v859_v62   ;;  %v2697_v62 = vld [vmem:[%s2934_s14 + $0x18] sm:$0xff] }
 0x4d2   :  { %v712_v9 = vpop.xlane.xlu2 %711 }
 0x4d3   :  { %2145 = vrcp.f32 %v712_v9  ;;  %v2702_v9 = vld [vmem:[%s2934_s14 + $0x10] sm:$0xff] }
 0x4d9   :  { %v2146_v10 = vpop.eup %2145 }
 0x4da   :  { %v718_v11 = vmul.f32 %v2146_v10, %v2522_v37  ;;  %v2708_v10 = vld [vmem:[%s2934_s14 + $0x8] sm:$0xff] }
 0x4dc   :  { %2054 = vmatmul.msk.f32.vlgmr.msra.gmra.mxu1 %vm268_vm2, %v718_v11 }
 0x4de   :  { %v715_v12 = vpop.xlane.xlu2 %714 }
 0x4df   :  { %2147 = vrcp.f32 %v715_v12 }
 0x4e3   :  { %v975_v31 = vpop.permute.xlu0 %974 }
 0x4e4   :  { %vm976_vm3 = vcmp.lt.s32.totalorder %v2676_v42, %v975_v31 }
 0x4e5   :  { %v2148_v13 = vpop.eup %2147  ;;  %vm977_vm5 = vmand %vm976_vm3, %vm2681_vm15 }
 0x4e6   :  { %v719_v14 = vmul.f32 %v2148_v13, %v2144_v50  ;;  %v891_v41 = vpop.permute.xlu2 %890 }
 0x4e7   :  { %vm892_vm14 = vcmp.lt.s32.totalorder %v2676_v42, %v891_v41  ;;  %v2759_v41 = vld [vmem:[%s2937_s17] sm:$0xff] }
 0x4e8   :  { %2055 = vmatmul.msk.f32.gmra.mxu1 %vm268_vm2, %v719_v14  ;;  %vm894_vm1 = vmand %vm892_vm14, %vm2681_vm15 }
 0x559   :  { %v749_v28 = vpop.f32.mrf.mxu1 }
 0x55a   :  { %v750_v29 = vadd.f32 %v749_v28, %v2644_v27 }
 0x55c   :  { %2056 = vmatmul.msk.f32.vlgmr.msra.gmra.mxu2 %vm268_vm2, %v750_v29  ;;  %2058 = vmatmul.msk.f32.vlgmr.msra.gmra.mxu3 %vm268_vm2, %v750_v29 }
 0x55d   :  { %2060 = vmatmul.msk.f32.vlgmr.msrb.gmra.mxu0 %vm268_vm2, %v750_v29  ;;  %v2732_v29 = vld [vmem:[%s2936_s16] ss:$0 sm:$0xff] }
 0x55e   :  { %1231 = vmatpush.msrb.mxu0 %v2557_v3 }
 0x560   :  { %1232 = vmatpush.msrb.mxu0 %v2574_v6 }
 0x562   :  { %1233 = vmatpush.msrb.mxu0 %v2596_v15 }
 0x564   :  { %1234 = vmatpush.msrb.mxu0 %v2613_v18 }
 0x565   :  { %v752_v32 = vpop.f32.mrf.mxu1 }
 0x566   :  { %v753_v33 = vadd.f32 %v752_v32, %v2656_v30 }
 0x568   :  { %2057 = vmatmul.msk.f32.gmra.mxu2 %vm268_vm2, %v753_v33  ;;  %2059 = vmatmul.msk.f32.gmra.mxu3 %vm268_vm2, %v753_v33 }
 0x569   :  { %2061 = vmatmul.msk.f32.gmra.mxu0 %vm268_vm2, %v753_v33 }
 0x571   :  { %2068 = vmatmul.msk.f32.vlgmr.msra.gmra.mxu0 %vm268_vm2, %v2503_v20 }
 0x579   :  { %2069 = vmatmul.msk.f32.gmra.mxu0 %vm268_vm2, %v2507_v23 }
 0x5da   :  { %v836_v34 = vpop.f32.mrf.mxu0 }
 0x5df   :  { %v809_v36 = vpop.f32.mrf.mxu3  ;;  %v782_v37 = vpop.f32.mrf.mxu2 }
 0x5e0   :  { %2062 = vmatpush.xpose.msk.msrb.mxu1 %vm268_vm2, %v809_v36 }
 0x5e3   :  { %2063 = vmatmul.msk.f32.vlgmr.msrb.gmra.mxu1 %vm268_vm2, %v782_v37  ;;  %v2746_v37 = vld [vmem:[%s2937_s17 + $0x10] sm:$0xff] }
 0x5e4   :  { %926 = vmatpush.msra.mxu1 %v836_v34  ;;  %v2739_v34 = vld [vmem:[%s2937_s17 + $0x18] sm:$0xff] }
 0x5e6   :  { %v839_v38 = vpop.f32.mrf.mxu0  ;;  %1062 = vmatpush.msrb.mxu1 %v2697_v62 }
 0x5e7   :  { %1008 = vmatpush.msrb.mxu3 %v839_v38 }
 0x5e8   :  { %1063 = vmatpush.msrb.mxu1 %v2702_v9 }
 0x5e9   :  { %1202 = vmatpush.msra.mxu3 %v2533_v63 }
 0x5ea   :  { %1064 = vmatpush.msrb.mxu1 %v2708_v10 }
 0x5eb   :  { %1203 = vmatpush.msra.mxu3 %v2539_v0  ;;  %v812_v39 = vpop.f32.mrf.mxu3  ;;  %v785_v40 = vpop.f32.mrf.mxu2 }
 0x5ec   :  { %2065 = vmatpush.xpose.msk.msrb.mxu2 %vm268_vm2, %v812_v39  ;;  %1065 = vmatpush.msrb.mxu1 %v2717_v25  ;;  %v2753_v39 = vld [vmem:[%s2937_s17 + $0x8] sm:$0xff] }
 0x5ed   :  { %1204 = vmatpush.msra.mxu3 %v2545_v1 }
 0x5ee   :  { %v2734_v32 = vpop.f32.mrf.mxu0 }
 0x5ef   :  { %1205 = vmatpush.msra.mxu3 %v2551_v2  ;;  %2066 = vmatmul.msk.f32.vlgmr.msrb.gmra.mxu2 %vm268_vm2, %v785_v40 }
 0x5f0   :  { %1151 = vmatpush.msra.mxu2 %v2739_v34 }
 0x5f2   :  { %1152 = vmatpush.msra.mxu2 %v2746_v37 }
 0x5f4   :  { %1153 = vmatpush.msra.mxu2 %v2753_v39 }
 0x5f6   :  { %1154 = vmatpush.msra.mxu2 %v2759_v41  ;;  %v2766_v31 = vpop.f32.mrf.mxu0 }
 0x5f8   :  { %1277 = vmatpush.msrb.mxu2 %v2567_v5 }
 0x5fa   :  { %1278 = vmatpush.msrb.mxu2 %v2584_v8 }
 0x5fc   :  { %1279 = vmatpush.msrb.mxu2 %v2606_v17 }
 0x5fe   :  { %1280 = vmatpush.msrb.mxu2 %v2623_v21 }
 0x660   :  { %v883_v43 = vpop.f32.mrf.mxu1 }
 0x661   :  { %v886_v45 = vmul.f32 0.17677669, %v883_v43 }
 0x663   :  { %v895_v46 = vsel %vm894_vm1, %v886_v45, -1e+30 }
 0x664   :  { %v897_v47 = vsel %vm896_vm0, %v895_v46, -inf }
 0x665   :  { %898 = vmax.xlane.f32.xlu1 %v897_v47 }
 0x672   :  { %v969_v48 = vpop.f32.mrf.mxu2 }
 0x673   :  { %v972_v49 = vmul.f32 0.17677669, %v969_v48 }
 0x675   :  { %v978_v50 = vsel %vm977_vm5, %v972_v49, -1e+30 }
 0x676   :  { %v979_v51 = vsel %vm896_vm0, %v978_v50, -inf }
 0x677   :  { %980 = vmax.xlane.f32.xlu1 %v979_v51 }
 0x6d8   :  { %v899_v52 = vpop.xlane.xlu1 %898 }
 0x6d9   :  { %v900_v53 = vsub.f32 %v895_v46, %v899_v52 }
 0x6db   :  { %v901_v54 = vmul.f32 1.442695, %v900_v53 }
 0x6dd   :  { %2149 = vpow2.f32 %v901_v54 }
 0x6e3   :  { %v2150_v55 = vpop.eup %2149 }
 0x6e4   :  { %v903_v56 = vsel %vm896_vm0, %v2150_v55, 0.0 }
 0x6e5   :  { %904 = vadd.xlane.f32.xlu2 %v903_v56 }
 0x6ea   :  { %v981_v57 = vpop.xlane.xlu1 %980 }
 0x6eb   :  { %v982_v58 = vsub.f32 %v978_v50, %v981_v57 }
 0x6ed   :  { %v983_v59 = vmul.f32 1.442695, %v982_v58 }
 0x6ef   :  { %2151 = vpow2.f32 %v983_v59 }
 0x6f5   :  { %v2152_v60 = vpop.eup %2151 }
 0x6f6   :  { %v985_v61 = vsel %vm896_vm0, %v2152_v60, 0.0 }
 0x6f7   :  { %986 = vadd.xlane.f32.xlu1 %v985_v61 }
 0x758   :  { %v905_v11 = vpop.xlane.xlu2 %904 }
 0x759   :  { %2153 = vrcp.f32 %v905_v11 }
 0x75f   :  { %v2154_v12 = vpop.eup %2153 }
 0x760   :  { %v907_v13 = vmul.f32 %v2154_v12, %v2150_v55 }
 0x762   :  { %2064 = vmatmul.msk.f32.vlgmr.msra.gmra.mxu1 %vm896_vm0, %v907_v13 }
 0x763   :  { %1254 = vmatpush.msra.mxu1 %v2562_v4 }
 0x765   :  { %1255 = vmatpush.msra.mxu1 %v2579_v7 }
 0x767   :  { %1256 = vmatpush.msra.mxu1 %v2601_v16 }
 0x769   :  { %1257 = vmatpush.msra.mxu1 %v2618_v19 }
 0x76a   :  { %v987_v14 = vpop.xlane.xlu1 %986 }
 0x76b   :  { %2155 = vrcp.f32 %v987_v14 }
 0x771   :  { %v2156_v22 = vpop.eup %2155 }
 0x772   :  { %v989_v24 = vmul.f32 %v2156_v22, %v2152_v60 }
 0x774   :  { %2067 = vmatmul.msk.f32.vlgmr.msrb.gmra.mxu3 %vm896_vm0, %v989_v24 }
 0x7df   :  { %v928_v26 = vpop.f32.mrf.mxu1 }
 0x7e0   :  { %2070 = vmatmul.msk.f32.vlgmr.msrb.gmra.mxu1 %vm268_vm2, %v928_v26 }
 0x7f7   :  { %v2725_v28 = vpop.f32.mrf.mxu3 }
 0x7f8   :  { %2071 = vmatmul.msk.f32.gmra.mxu1 %vm268_vm2, %v2725_v28 }
 0x85d   :  { %v1067_v33 = vpop.f32.mrf.mxu1 }
 0x85e   :  { %v1068_v36 = vadd.f32 %v1067_v33, %v2734_v32 }
 0x860   :  { %v1077_v38 = vadd.f32 %v2732_v29, %v1068_v36 }
 0x862   :  { %v2072_v40 = vmul.f32 -1.442695, %v1077_v38 }
 0x864   :  { %2157 = vpow2.f32 %v2072_v40 }
 0x86a   :  { %v2158_v43 = vpop.eup %2157 }
 0x86b   :  { %v1085_v45 = vadd.f32 1.0, %v2158_v43 }
 0x86d   :  { %2159 = vrcp.f32 %v1085_v45  ;;  %v1098_v51 = vand.u32 2147483648, %v1085_v45  ;;  %v1096_v54 = vand.u32 2147483647, %v1085_v45  ;;  %vm1092_vm7 = vweird.f32 %v1085_v45 }
 0x86f   :  { %v1099_v57 = vor.u32 1.1754944e-38, %v1098_v51  ;;  %vm1097_vm9 = vcmp.eq.f32.partialorder %v1096_v54, 8.507059e+37  ;;  %v2782_v51 = vld [vmem:[%s2938_s18] ss:$0 sm:$0xff]  ;;  %s2266_s18 = smov [#allocation2]  }
 0x870   :  { %s1960_s11 = sshll.u32 %s2266_s18, 4  ;;  %s1961_s11 = int_to_ptr.vmem [resolvable:$true] %s1960_s11 }
 0x871   :  { %1968 = dma.vmem_to_hbm [thread:$0]  %s1961_s11, 256, %s1963_s2, [#allocation3], %s2267_s6, %s2267_s6, %s2268_s15  }
 0x873   :  { %v2160_v46 = vpop.eup %2159 }
 0x874   :  { %v1088_v47 = vmul.f32 %v2160_v46, %v1085_v45  ;;  %vm1093_vm6 = vweird.f32 %v2160_v46 }
 0x875   :  { %v1070_v48 = vpop.f32.mrf.mxu1  ;;  %vm1094_vm8 = vmor %vm1092_vm7, %vm1093_vm6 }
 0x876   :  { %v1089_v49 = vsub.f32 1.0, %v1088_v47  ;;  %v1071_v50 = vadd.f32 %v1070_v48, %v2766_v31 }
 0x878   :  { %v1090_v52 = vmul.f32 %v2160_v46, %v1089_v49  ;;  %v1078_v53 = vadd.f32 %v2732_v29, %v1071_v50 }
 0x87a   :  { %v2073_v55 = vmul.f32 -1.442695, %v1078_v53  ;;  %v1091_v56 = vadd.f32 %v2160_v46, %v1090_v52 }
 0x87c   :  { %2161 = vpow2.f32 %v2073_v55  ;;  %v1095_v58 = vsel %vm1094_vm8, %v2160_v46, %v1091_v56 }
 0x87d   :  { %v1100_v59 = vsel %vm1097_vm9, %v1099_v57, %v1095_v58 }
 0x87e   :  { %v1119_v60 = vsub.f32 1.0, %v1100_v59  ;;  %v1117_v61 = vmul.f32 %v1100_v59, %v2503_v20 }
 0x880   :  { %v1121_v11 = vmul.f32 %v1119_v60, %v928_v26 }
 0x882   :  { %v2162_v12 = vpop.eup %2161  ;;  %v1123_v13 = vadd.f32 %v1121_v11, %v1117_v61 }
 0x883   :  { %v1086_v14 = vadd.f32 1.0, %v2162_v12 }
 0x884   :  { %2074 = vmatmul.msk.f32.vlgmr.msra.gmra.mxu2 %vm268_vm2, %v1123_v13 }
 0x885   :  { %2163 = vrcp.f32 %v1086_v14  ;;  %1470 = vmatpush.msra.mxu2 %v2697_v62  ;;  %v1113_v36 = vand.u32 2147483648, %v1086_v14  ;;  %v1111_v26 = vand.u32 2147483647, %v1086_v14  ;;  %vm1107_vm11 = vweird.f32 %v1086_v14 }
 0x887   :  { %1471 = vmatpush.msra.mxu2 %v2702_v9  ;;  %v1114_v43 = vor.u32 1.1754944e-38, %v1113_v36  ;;  %vm1112_vm13 = vcmp.eq.f32.partialorder %v1111_v26, 8.507059e+37 }
 0x889   :  { %1472 = vmatpush.msra.mxu2 %v2708_v10 }
 0x88b   :  { %v2164_v22 = vpop.eup %2163  ;;  %1473 = vmatpush.msra.mxu2 %v2717_v25 }
 0x88c   :  { %v1103_v24 = vmul.f32 %v2164_v22, %v1086_v14  ;;  %vm1108_vm10 = vweird.f32 %v2164_v22 }
 0x88d   :  { %vm1109_vm12 = vmor %vm1107_vm11, %vm1108_vm10 }
 0x88e   :  { %v1104_v33 = vsub.f32 1.0, %v1103_v24 }
 0x890   :  { %v1105_v38 = vmul.f32 %v2164_v22, %v1104_v33 }
 0x892   :  { %v1106_v40 = vadd.f32 %v2164_v22, %v1105_v38 }
 0x894   :  { %v1110_v45 = vsel %vm1109_vm12, %v2164_v22, %v1106_v40 }
 0x895   :  { %v1115_v46 = vsel %vm1112_vm13, %v1114_v43, %v1110_v45 }
 0x896   :  { %v1120_v47 = vsub.f32 1.0, %v1115_v46  ;;  %v1118_v48 = vmul.f32 %v1115_v46, %v2507_v23 }
 0x898   :  { %v1122_v49 = vmul.f32 %v1120_v47, %v2725_v28 }
 0x89a   :  { %v1124_v50 = vadd.f32 %v1122_v49, %v1118_v48 }
 0x89c   :  { %2075 = vmatmul.msk.f32.gmra.mxu2 %vm268_vm2, %v1124_v50 }
 0x907   :  { %v1156_v52 = vpop.f32.mrf.mxu2 }
 0x908   :  { %v1157_v53 = vadd.f32 %v2782_v51, %v1156_v52 }
 0x90a   :  { %v1162_v54 = vsel %vm268_vm2, %v1157_v53, -inf }
 0x90b   :  { %1163 = vmax.xlane.f32.xlu0 %v1162_v54 }
 0x91f   :  { %v1159_v55 = vpop.f32.mrf.mxu2 }
 0x920   :  { %v1160_v56 = vadd.f32 %v2782_v51, %v1159_v55 }
 0x922   :  { %v1165_v57 = vsel %vm268_vm2, %v1160_v56, -inf }
 0x923   :  { %1166 = vmax.xlane.f32.xlu1 %v1165_v57 }
 0x97e   :  { %v1164_v28 = vpop.xlane.xlu0 %1163 }
 0x97f   :  { %v1168_v58 = vsub.f32 %v1157_v53, %v1164_v28  ;;  %vm1288_vm14 = vcmp.ge.f32.partialorder %v1157_v53, %v1164_v28 }
 0x980   :  { %v1289_v11 = vsel %vm1288_vm14, %v2519_v35, 8 }
 0x981   :  { %v1170_v59 = vmul.f32 1.442695, %v1168_v58  ;;  %v1290_v12 = vsel %vm846_vm4, %v1289_v11, 2147483647 }
 0x982   :  { %v1291_v24 = vrot.slane %v1290_v12, 4 }
 0x983   :  { %2165 = vpow2.f32 %v1170_v59 }
 0x984   :  { %vm1292_vm5 = vcmp.lt.s32.totalorder %v1290_v12, %v1291_v24 }
 0x985   :  { %v1293_v43 = vsel %vm1292_vm5, %v1290_v12, %v1291_v24 }
 0x986   :  { %v1294_v49 = vrot.slane %v1293_v43, 2 }
 0x988   :  { %vm1295_vm9 = vcmp.lt.s32.totalorder %v1293_v43, %v1294_v49 }
 0x989   :  { %v2166_v60 = vpop.eup %2165  ;;  %v1296_v54 = vsel %vm1295_vm9, %v1293_v43, %v1294_v49 }
 0x98a   :  { %v1174_v61 = vsel %vm268_vm2, %v2166_v60, 0.0  ;;  %v1297_v55 = vrot.slane %v1296_v54, 1 }
 0x98b   :  { %1175 = vadd.xlane.f32.xlu1 %v1174_v61 }
 0x98c   :  { %vm1298_vm10 = vcmp.lt.s32.totalorder %v1296_v54, %v1297_v55 }
 0x996   :  { %v1167_v13 = vpop.xlane.xlu1 %1166 }
 0x997   :  { %v1169_v14 = vsub.f32 %v1160_v56, %v1167_v13  ;;  %vm1370_vm1 = vcmp.ge.f32.partialorder %v1160_v56, %v1167_v13  ;;  %v1299_v56 = vsel %vm1298_vm10, %v1296_v54, %v1297_v55 }
 0x998   :  { %v1371_v22 = vsel %vm1370_vm1, %v2519_v35, 8  ;;  %v1301_v57 = vadd.s32 1, %v1299_v56  ;;  %vm1300_vm11 = vcmp.lt.s32.totalorder %v1299_v56, 8 }
 0x999   :  { %v1172_v33 = vmul.f32 1.442695, %v1169_v14  ;;  %v1372_v36 = vsel %vm846_vm4, %v1371_v22, 2147483647 }
 0x99a   :  { %v1373_v38 = vrot.slane %v1372_v36, 4  ;;  %v1302_v28 = vsel %vm1300_vm11, %v1301_v57, 8 }
 0x99b   :  { %2167 = vpow2.f32 %v1172_v33 }
 0x99c   :  { %vm1374_vm3 = vcmp.lt.s32.totalorder %v1372_v36, %v1373_v38 }
 0x99d   :  { %v1375_v26 = vsel %vm1374_vm3, %v1372_v36, %v1373_v38 }
 0x99e   :  { %v1376_v40 = vrot.slane %v1375_v26, 2 }
 0x9a0   :  { %vm1377_vm6 = vcmp.lt.s32.totalorder %v1375_v26, %v1376_v40 }
 0x9a1   :  { %v2168_v45 = vpop.eup %2167  ;;  %v1378_v46 = vsel %vm1377_vm6, %v1375_v26, %v1376_v40 }
 0x9a2   :  { %v1177_v47 = vsel %vm268_vm2, %v2168_v45, 0.0  ;;  %v1379_v48 = vrot.slane %v1378_v46, 1 }
 0x9a3   :  { %1178 = vadd.xlane.f32.xlu1 %v1177_v47 }
 0x9a4   :  { %vm1380_vm7 = vcmp.lt.s32.totalorder %v1378_v46, %v1379_v48 }
 0x9a5   :  { %v1381_v50 = vsel %vm1380_vm7, %v1378_v46, %v1379_v48 }
 0x9a6   :  { %vm1382_vm8 = vcmp.lt.s32.totalorder %v1381_v50, 8  ;;  %v1383_v52 = vadd.s32 1, %v1381_v50 }
 0x9a8   :  { %v1384_v53 = vsel %vm1382_vm8, %v1383_v52, 8 }
 0x9a9   :  { %1413 = vperm.xlu2 %2125, %v1384_v53  }
 0x9bc   :  { %1331 = vperm.xlu1 %2124, %v1302_v28  }
 0x9fe   :  { %v1176_v58 = vpop.xlane.xlu1 %1175 }
 0x9ff   :  { %2169 = vrcp.f32 %v1176_v58 }
 0xa05   :  { %v2170_v59 = vpop.eup %2169 }
 0xa06   :  { %v1182_v61 = vmul.f32 %v2170_v59, %v2166_v60 }
 0xa08   :  { %2076 = vmatmul.msk.f32.vlgmr.msra.gmra.mxu3 %vm268_vm2, %v1182_v61 }
 0xa16   :  { %v1179_v11 = vpop.xlane.xlu1 %1178 }
 0xa17   :  { %2171 = vrcp.f32 %v1179_v11 }
 0xa1d   :  { %v2172_v12 = vpop.eup %2171 }
 0xa1e   :  { %v1183_v13 = vmul.f32 %v2172_v12, %v2168_v45 }
 0xa20   :  { %2077 = vmatmul.msk.f32.gmra.mxu3 %vm268_vm2, %v1183_v13 }
 0xa8b   :  { %v1207_v14 = vpop.f32.mrf.mxu3 }
 0xa8c   :  { %v1208_v22 = vadd.f32 %v1207_v14, %v2644_v27 }
 0xa8e   :  { %2078 = vmatmul.msk.f32.vlgmr.msrb.gmra.mxu0 %vm268_vm2, %v1208_v22  ;;  %2080 = vmatmul.msk.f32.vlgmr.msra.gmra.mxu1 %vm268_vm2, %v1208_v22 }
 0xa8f   :  { %2082 = vmatmul.msk.f32.vlgmr.msrb.gmra.mxu2 %vm268_vm2, %v1208_v22 }
 0xa90   :  { %1650 = vmatpush.msrb.mxu2 %v2562_v4 }
 0xa92   :  { %1651 = vmatpush.msrb.mxu2 %v2579_v7 }
 0xa94   :  { %1652 = vmatpush.msrb.mxu2 %v2601_v16 }
 0xa96   :  { %1653 = vmatpush.msrb.mxu2 %v2618_v19 }
 0xaa3   :  { %v1210_v60 = vpop.f32.mrf.mxu3 }
 0xaa4   :  { %v1211_v24 = vadd.f32 %v1210_v60, %v2656_v30 }
 0xaa6   :  { %2079 = vmatmul.msk.f32.gmra.mxu0 %vm268_vm2, %v1211_v24  ;;  %2081 = vmatmul.msk.f32.gmra.mxu1 %vm268_vm2, %v1211_v24 }
 0xaa7   :  { %2083 = vmatmul.msk.f32.gmra.mxu2 %vm268_vm2, %v1211_v24 }
 0xb0b   :  { %v1259_v33 = vpop.f32.mrf.mxu1  ;;  %v1236_v36 = vpop.f32.mrf.mxu0 }
 0xb0c   :  { %2084 = vmatpush.xpose.msk.msrb.mxu3 %vm268_vm2, %v1259_v33 }
 0xb0f   :  { %2085 = vmatmul.msk.f32.vlgmr.msrb.gmra.mxu3 %vm268_vm2, %v1236_v36 }
 0xb12   :  { %v1282_v4 = vpop.f32.mrf.mxu2 }
 0xb13   :  { %1365 = vmatpush.msra.mxu3 %v1282_v4 }
 0xb15   :  { %1547 = vmatpush.msrb.mxu3 %v2739_v34 }
 0xb17   :  { %1548 = vmatpush.msrb.mxu3 %v2746_v37 }
 0xb19   :  { %1549 = vmatpush.msrb.mxu3 %v2753_v39 }
 0xb1b   :  { %1550 = vmatpush.msrb.mxu3 %v2759_v41 }
 0xb23   :  { %v1262_v7 = vpop.f32.mrf.mxu1  ;;  %v1239_v16 = vpop.f32.mrf.mxu0 }
 0xb24   :  { %2087 = vmatpush.xpose.msk.msra.mxu0 %vm268_vm2, %v1262_v7 }
 0xb27   :  { %2088 = vmatmul.msk.f32.vlgmr.msra.gmra.mxu0 %vm268_vm2, %v1239_v16 }
 0xb28   :  { %1598 = vmatpush.msrb.mxu0 %v2533_v63  ;;  %v1332_v63 = vpop.permute.xlu1 %1331 }
 0xb29   :  { %vm1333_vm12 = vcmp.lt.s32.totalorder %v2676_v42, %v1332_v63 }
 0xb2a   :  { %1599 = vmatpush.msrb.mxu0 %v2539_v0  ;;  %v1285_v19 = vpop.f32.mrf.mxu2  ;;  %vm1334_vm13 = vmand %vm1333_vm12, %vm2681_vm15 }
 0xb2b   :  { %1447 = vmatpush.msrb.mxu1 %v1285_v19 }
 0xb2c   :  { %1600 = vmatpush.msrb.mxu0 %v2545_v1 }
 0xb2d   :  { %1627 = vmatpush.msra.mxu1 %v2557_v3 }
 0xb2e   :  { %1601 = vmatpush.msrb.mxu0 %v2551_v2  ;;  %v1414_v2 = vpop.permute.xlu2 %1413 }
 0xb2f   :  { %1628 = vmatpush.msra.mxu1 %v2574_v6  ;;  %vm1415_vm14 = vcmp.lt.s32.totalorder %v2676_v42, %v1414_v2 }
 0xb30   :  { %vm1416_vm1 = vmand %vm1415_vm14, %vm2681_vm15 }
 0xb31   :  { %1629 = vmatpush.msra.mxu1 %v2596_v15 }
 0xb33   :  { %1630 = vmatpush.msra.mxu1 %v2613_v18 }
 0xb92   :  { %v1326_v38 = vpop.f32.mrf.mxu3 }
 0xb93   :  { %v1329_v26 = vmul.f32 0.17677669, %v1326_v38 }
 0xb95   :  { %v1335_v0 = vsel %vm1334_vm13, %v1329_v26, -1e+30 }
 0xb96   :  { %v1336_v1 = vsel %vm896_vm0, %v1335_v0, -inf }
 0xb97   :  { %1337 = vmax.xlane.f32.xlu0 %v1336_v1 }
 0xba4   :  { %v1408_v3 = vpop.f32.mrf.mxu0 }
 0xba5   :  { %v1411_v6 = vmul.f32 0.17677669, %v1408_v3 }
 0xba7   :  { %v1417_v15 = vsel %vm1416_vm1, %v1411_v6, -1e+30 }
 0xba8   :  { %v1418_v18 = vsel %vm896_vm0, %v1417_v15, -inf }
 0xba9   :  { %1419 = vmax.xlane.f32.xlu0 %v1418_v18 }
 0xc0a   :  { %v1338_v40 = vpop.xlane.xlu0 %1337 }
 0xc0b   :  { %v1339_v43 = vsub.f32 %v1335_v0, %v1338_v40 }
 0xc0d   :  { %v1340_v45 = vmul.f32 1.442695, %v1339_v43 }
 0xc0f   :  { %2173 = vpow2.f32 %v1340_v45 }
 0xc15   :  { %v2174_v46 = vpop.eup %2173 }
 0xc16   :  { %v1342_v47 = vsel %vm896_vm0, %v2174_v46, 0.0 }
 0xc17   :  { %1343 = vadd.xlane.f32.xlu1 %v1342_v47 }
 0xc1c   :  { %v1420_v48 = vpop.xlane.xlu0 %1419 }
 0xc1d   :  { %v1421_v49 = vsub.f32 %v1417_v15, %v1420_v48 }
 0xc1f   :  { %v1422_v50 = vmul.f32 1.442695, %v1421_v49 }
 0xc21   :  { %2175 = vpow2.f32 %v1422_v50 }
 0xc27   :  { %v2176_v52 = vpop.eup %2175 }
 0xc28   :  { %v1424_v53 = vsel %vm896_vm0, %v2176_v52, 0.0 }
 0xc29   :  { %1425 = vadd.xlane.f32.xlu0 %v1424_v53 }
 0xc8a   :  { %v1344_v54 = vpop.xlane.xlu1 %1343 }
 0xc8b   :  { %2177 = vrcp.f32 %v1344_v54 }
 0xc91   :  { %v2178_v55 = vpop.eup %2177 }
 0xc92   :  { %v1346_v56 = vmul.f32 %v2178_v55, %v2174_v46 }
 0xc94   :  { %2086 = vmatmul.msk.f32.vlgmr.msra.gmra.mxu3 %vm896_vm0, %v1346_v56 }
 0xc95   :  { %1673 = vmatpush.msra.mxu3 %v2567_v5 }
 0xc97   :  { %1674 = vmatpush.msra.mxu3 %v2584_v8 }
 0xc99   :  { %1675 = vmatpush.msra.mxu3 %v2606_v17 }
 0xc9b   :  { %1676 = vmatpush.msra.mxu3 %v2623_v21 }
 0xc9c   :  { %v1426_v57 = vpop.xlane.xlu0 %1425 }
 0xc9d   :  { %2179 = vrcp.f32 %v1426_v57 }
 0xca3   :  { %v2180_v28 = vpop.eup %2179 }
 0xca4   :  { %v1428_v58 = vmul.f32 %v2180_v28, %v2176_v52 }
 0xca6   :  { %2089 = vmatmul.msk.f32.vlgmr.msrb.gmra.mxu1 %vm896_vm0, %v1428_v58 }
 0xd17   :  { %v1367_v59 = vpop.f32.mrf.mxu3 }
 0xd18   :  { %2090 = vmatmul.msk.f32.vlgmr.msra.gmra.mxu2 %vm268_vm2, %v1367_v59 }
 0xd19   :  { %1866 = vmatpush.msra.mxu2 %v2697_v62 }
 0xd1b   :  { %1867 = vmatpush.msra.mxu2 %v2702_v9 }
 0xd1d   :  { %1868 = vmatpush.msra.mxu2 %v2708_v10 }
 0xd1f   :  { %1869 = vmatpush.msra.mxu2 %v2717_v25 }
 0xd23   :  { %v1449_v5 = vpop.f32.mrf.mxu1 }
 0xd24   :  { %2091 = vmatmul.msk.f32.gmra.mxu2 %vm268_vm2, %v1449_v5 }
 0xd9b   :  { %v1475_v8 = vpop.f32.mrf.mxu2 }
 0xd9c   :  { %v1476_v17 = vadd.f32 %v1475_v8, %v2734_v32 }
 0xd9e   :  { %v1481_v21 = vadd.f32 %v2732_v29, %v1476_v17 }
 0xda0   :  { %v2092_v61 = vmul.f32 -1.442695, %v1481_v21 }
 0xda2   :  { %2181 = vpow2.f32 %v2092_v61 }
 0xda7   :  { %v1478_v11 = vpop.f32.mrf.mxu2 }
 0xda8   :  { %v2182_v12 = vpop.eup %2181  ;;  %v1479_v62 = vadd.f32 %v1478_v11, %v2766_v31 }
 0xda9   :  { %v1489_v13 = vadd.f32 1.0, %v2182_v12 }
 0xdaa   :  { %v1482_v9 = vadd.f32 %v2732_v29, %v1479_v62 }
 0xdab   :  { %2183 = vrcp.f32 %v1489_v13  ;;  %v1502_v24 = vand.u32 2147483648, %v1489_v13  ;;  %v1500_v4 = vand.u32 2147483647, %v1489_v13  ;;  %vm1496_vm5 = vweird.f32 %v1489_v13 }
 0xdac   :  { %v2093_v10 = vmul.f32 -1.442695, %v1482_v9 }
 0xdad   :  { %v1503_v16 = vor.u32 1.1754944e-38, %v1502_v24  ;;  %vm1501_vm7 = vcmp.eq.f32.partialorder %v1500_v4, 8.507059e+37 }
 0xdae   :  { %2185 = vpow2.f32 %v2093_v10 }
 0xdb1   :  { %v2184_v25 = vpop.eup %2183 }
 0xdb2   :  { %v1492_v14 = vmul.f32 %v2184_v25, %v1489_v13  ;;  %vm1497_vm3 = vweird.f32 %v2184_v25 }
 0xdb3   :  { %vm1498_vm6 = vmor %vm1496_vm5, %vm1497_vm3 }
 0xdb4   :  { %v2186_v22 = vpop.eup %2185  ;;  %v1493_v60 = vsub.f32 1.0, %v1492_v14 }
 0xdb5   :  { %v1490_v33 = vadd.f32 1.0, %v2186_v22 }
 0xdb6   :  { %v1494_v36 = vmul.f32 %v2184_v25, %v1493_v60 }
 0xdb7   :  { %2187 = vrcp.f32 %v1490_v33  ;;  %v1517_v15 = vand.u32 2147483648, %v1490_v33  ;;  %v1515_v40 = vand.u32 2147483647, %v1490_v33  ;;  %vm1511_vm9 = vweird.f32 %v1490_v33 }
 0xdb8   :  { %v1495_v7 = vadd.f32 %v2184_v25, %v1494_v36 }
 0xdb9   :  { %v1518_v45 = vor.u32 1.1754944e-38, %v1517_v15  ;;  %vm1516_vm11 = vcmp.eq.f32.partialorder %v1515_v40, 8.507059e+37 }
 0xdba   :  { %v1499_v19 = vsel %vm1498_vm6, %v2184_v25, %v1495_v7 }
 0xdbb   :  { %v1504_v63 = vsel %vm1501_vm7, %v1503_v16, %v1499_v19 }
 0xdbc   :  { %v1523_v38 = vsub.f32 1.0, %v1504_v63  ;;  %v1521_v1 = vmul.f32 %v1504_v63, %v2503_v20 }
 0xdbd   :  { %v2188_v26 = vpop.eup %2187 }
 0xdbe   :  { %v1507_v0 = vmul.f32 %v2188_v26, %v1490_v33  ;;  %v1525_v2 = vmul.f32 %v1523_v38, %v1367_v59  ;;  %vm1512_vm8 = vweird.f32 %v2188_v26 }
 0xdbf   :  { %vm1513_vm10 = vmor %vm1511_vm9, %vm1512_vm8 }
 0xdc0   :  { %v1527_v3 = vadd.f32 %v1525_v2, %v1521_v1  ;;  %v1508_v6 = vsub.f32 1.0, %v1507_v0 }
 0xdc2   :  { %2094 = vmatmul.msk.f32.vlgmr.msrb.gmra.mxu3 %vm268_vm2, %v1527_v3  ;;  %v1509_v18 = vmul.f32 %v2188_v26, %v1508_v6 }
 0xdc3   :  { %1943 = vmatpush.msrb.mxu3 %v2739_v34 }
 0xdc4   :  { %v1510_v43 = vadd.f32 %v2188_v26, %v1509_v18 }
 0xdc5   :  { %1944 = vmatpush.msrb.mxu3 %v2746_v37 }
 0xdc6   :  { %v1514_v46 = vsel %vm1513_vm10, %v2188_v26, %v1510_v43 }
 0xdc7   :  { %v1519_v47 = vsel %vm1516_vm11, %v1518_v45, %v1514_v46  ;;  %1945 = vmatpush.msrb.mxu3 %v2753_v39 }
 0xdc8   :  { %v1524_v48 = vsub.f32 1.0, %v1519_v47  ;;  %v1522_v49 = vmul.f32 %v1519_v47, %v2507_v23 }
 0xdc9   :  { %1946 = vmatpush.msrb.mxu3 %v2759_v41 }
 0xdca   :  { %v1526_v50 = vmul.f32 %v1524_v48, %v1449_v5 }
 0xdcc   :  { %v1528_v52 = vadd.f32 %v1526_v50, %v1522_v49 }
 0xdce   :  { %2095 = vmatmul.msk.f32.gmra.mxu3 %vm268_vm2, %v1528_v52 }
 0xe45   :  { %v1552_v34 = vpop.f32.mrf.mxu3 }
 0xe46   :  { %v1553_v53 = vadd.f32 %v2782_v51, %v1552_v34 }
 0xe48   :  { %v1558_v54 = vsel %vm268_vm2, %v1553_v53, -inf }
 0xe49   :  { %1559 = vmax.xlane.f32.xlu2 %v1558_v54 }
 0xe51   :  { %v1555_v37 = vpop.f32.mrf.mxu3 }
 0xe52   :  { %v1556_v55 = vadd.f32 %v2782_v51, %v1555_v37 }
 0xe54   :  { %v1561_v39 = vsel %vm268_vm2, %v1556_v55, -inf }
 0xe55   :  { %1562 = vmax.xlane.f32.xlu0 %v1561_v39 }
 0xebc   :  { %v1560_v56 = vpop.xlane.xlu2 %1559 }
 0xebd   :  { %v1564_v41 = vsub.f32 %v1553_v53, %v1560_v56  ;;  %vm1684_vm12 = vcmp.ge.f32.partialorder %v1553_v53, %v1560_v56 }
 0xebe   :  { %v1685_v28 = vsel %vm1684_vm12, %v2519_v35, 8 }
 0xebf   :  { %v1566_v57 = vmul.f32 1.442695, %v1564_v41  ;;  %v1686_v58 = vsel %vm846_vm4, %v1685_v28, 2147483647 }
 0xec0   :  { %v1687_v59 = vrot.slane %v1686_v58, 4 }
 0xec1   :  { %2189 = vpow2.f32 %v1566_v57 }
 0xec2   :  { %vm1688_vm14 = vcmp.lt.s32.totalorder %v1686_v58, %v1687_v59 }
 0xec3   :  { %v1689_v13 = vsel %vm1688_vm14, %v1686_v58, %v1687_v59 }
 0xec4   :  { %v1690_v10 = vrot.slane %v1689_v13, 2 }
 0xec6   :  { %vm1691_vm5 = vcmp.lt.s32.totalorder %v1689_v13, %v1690_v10 }
 0xec7   :  { %v2190_v5 = vpop.eup %2189  ;;  %v1692_v33 = vsel %vm1691_vm5, %v1689_v13, %v1690_v10 }
 0xec8   :  { %v1563_v8 = vpop.xlane.xlu0 %1562  ;;  %v1570_v17 = vsel %vm268_vm2, %v2190_v5, 0.0  ;;  %v1693_v7 = vrot.slane %v1692_v33, 1 }
 0xec9   :  { %v1565_v21 = vsub.f32 %v1556_v55, %v1563_v8  ;;  %vm1766_vm13 = vcmp.ge.f32.partialorder %v1556_v55, %v1563_v8  ;;  %1571 = vadd.xlane.f32.xlu0 %v1570_v17 }
 0xeca   :  { %v1767_v61 = vsel %vm1766_vm13, %v2519_v35, 8 }
 0xecb   :  { %v1568_v11 = vmul.f32 1.442695, %v1565_v21  ;;  %v1768_v12 = vsel %vm846_vm4, %v1767_v61, 2147483647  ;;  %vm1694_vm4 = vcmp.lt.s32.totalorder %v1692_v33, %v1693_v7 }
 0xecc   :  { %v1769_v62 = vrot.slane %v1768_v12, 4  ;;  %v1695_v16 = vsel %vm1694_vm4, %v1692_v33, %v1693_v7 }
 0xecd   :  { %2191 = vpow2.f32 %v1568_v11  ;;  %v1697_v19 = vadd.s32 1, %v1695_v16  ;;  %vm1696_vm8 = vcmp.lt.s32.totalorder %v1695_v16, 8 }
 0xece   :  { %vm1770_vm1 = vcmp.lt.s32.totalorder %v1768_v12, %v1769_v62 }
 0xecf   :  { %v1771_v9 = vsel %vm1770_vm1, %v1768_v12, %v1769_v62  ;;  %v1698_v63 = vsel %vm1696_vm8, %v1697_v19, 8 }
 0xed0   :  { %v1772_v25 = vrot.slane %v1771_v9, 2 }
 0xed2   :  { %vm1773_vm3 = vcmp.lt.s32.totalorder %v1771_v9, %v1772_v25 }
 0xed3   :  { %v2192_v14 = vpop.eup %2191  ;;  %v1774_v22 = vsel %vm1773_vm3, %v1771_v9, %v1772_v25 }
 0xed4   :  { %v1573_v60 = vsel %vm268_vm2, %v2192_v14, 0.0  ;;  %v1775_v24 = vrot.slane %v1774_v22, 1 }
 0xed5   :  { %1574 = vadd.xlane.f32.xlu0 %v1573_v60 }
 0xed6   :  { %vm1776_vm6 = vcmp.lt.s32.totalorder %v1774_v22, %v1775_v24 }
 0xed7   :  { %v1777_v35 = vsel %vm1776_vm6, %v1774_v22, %v1775_v24 }
 0xed8   :  { %vm1778_vm7 = vcmp.lt.s32.totalorder %v1777_v35, 8  ;;  %v1779_v36 = vadd.s32 1, %v1777_v35 }
 0xeda   :  { %v1780_v4 = vsel %vm1778_vm7, %v1779_v36, 8 }
 0xedb   :  { %1809 = vperm.xlu1 %2124, %v1780_v4  }
 0xee9   :  { %1727 = vperm.xlu0 %2123, %v1698_v63  }
 0xf3c   :  { %v1572_v38 = vpop.xlane.xlu0 %1571 }
 0xf3d   :  { %2193 = vrcp.f32 %v1572_v38 }
 0xf43   :  { %v2194_v26 = vpop.eup %2193 }
 0xf44   :  { %v1578_v0 = vmul.f32 %v2194_v26, %v2190_v5 }
 0xf46   :  { %2096 = vmatmul.msk.f32.vlgmr.msrb.gmra.mxu0 %vm268_vm2, %v1578_v0 }
 0xf48   :  { %v1575_v1 = vpop.xlane.xlu0 %1574 }
 0xf49   :  { %2195 = vrcp.f32 %v1575_v1 }
 0xf4d   :  { %v1810_v53 = vpop.permute.xlu1 %1809 }
 0xf4e   :  { %vm1811_vm11 = vcmp.lt.s32.totalorder %v2676_v42, %v1810_v53 }
 0xf4f   :  { %v2196_v2 = vpop.eup %2195  ;;  %vm1812_vm12 = vmand %vm1811_vm11, %vm2681_vm15 }
 0xf50   :  { %v1579_v3 = vmul.f32 %v2196_v2, %v2192_v14 }
 0xf52   :  { %2097 = vmatmul.msk.f32.gmra.mxu0 %vm268_vm2, %v1579_v3 }
 0xf5b   :  { %v1728_v48 = vpop.permute.xlu0 %1727 }
 0xf5c   :  { %vm1729_vm9 = vcmp.lt.s32.totalorder %v2676_v42, %v1728_v48 }
 0xf5d   :  { %vm1730_vm10 = vmand %vm1729_vm9, %vm2681_vm15 }
 0xfc3   :  { %v1603_v6 = vpop.f32.mrf.mxu0 }
 0xfc4   :  { %v1604_v15 = vadd.f32 %v1603_v6, %v2644_v27 }
 0xfc6   :  { %2098 = vmatmul.msk.f32.vlgmr.msra.gmra.mxu1 %vm268_vm2, %v1604_v15  ;;  %2100 = vmatmul.msk.f32.vlgmr.msrb.gmra.mxu2 %vm268_vm2, %v1604_v15 }
 0xfc7   :  { %2102 = vmatmul.msk.f32.vlgmr.msra.gmra.mxu3 %vm268_vm2, %v1604_v15 }
 0xfcf   :  { %v1606_v18 = vpop.f32.mrf.mxu0 }
 0xfd0   :  { %v1607_v40 = vadd.f32 %v1606_v18, %v2656_v30 }
 0xfd2   :  { %2099 = vmatmul.msk.f32.gmra.mxu1 %vm268_vm2, %v1607_v40  ;;  %2101 = vmatmul.msk.f32.gmra.mxu2 %vm268_vm2, %v1607_v40 }
 0xfd3   :  { %2103 = vmatmul.msk.f32.gmra.mxu3 %vm268_vm2, %v1607_v40 }
0x1043   :  { %v1632_v27 = vpop.f32.mrf.mxu1 }
0x1049   :  { %v1655_v43 = vpop.f32.mrf.mxu2 }
0x104a   :  { %v1678_v45 = vpop.f32.mrf.mxu3  ;;  %2104 = vmatpush.xpose.msk.msra.mxu0 %vm268_vm2, %v1655_v43 }
0x104b   :  { %1761 = vmatpush.msrb.mxu1 %v1678_v45 }
0x104d   :  { %2105 = vmatmul.msk.f32.vlgmr.msra.gmra.mxu0 %vm268_vm2, %v1632_v27 }
0x104f   :  { %v1635_v30 = vpop.f32.mrf.mxu1 }
0x1055   :  { %v1658_v46 = vpop.f32.mrf.mxu2 }
0x1056   :  { %v1681_v47 = vpop.f32.mrf.mxu3  ;;  %2107 = vmatpush.xpose.msk.msrb.mxu0 %vm268_vm2, %v1658_v46 }
0x1057   :  { %1843 = vmatpush.msra.mxu1 %v1681_v47 }
0x1059   :  { %2108 = vmatmul.msk.f32.vlgmr.msrb.gmra.mxu0 %vm268_vm2, %v1635_v30 }
0x10ca   :  { %v1722_v49 = vpop.f32.mrf.mxu0 }
0x10cb   :  { %v1725_v50 = vmul.f32 0.17677669, %v1722_v49 }
0x10cd   :  { %v1731_v52 = vsel %vm1730_vm10, %v1725_v50, -1e+30 }
0x10ce   :  { %v1732_v34 = vsel %vm896_vm0, %v1731_v52, -inf }
0x10cf   :  { %1733 = vmax.xlane.f32.xlu2 %v1732_v34 }
0x10d6   :  { %v1804_v54 = vpop.f32.mrf.mxu0 }
0x10d7   :  { %v1807_v37 = vmul.f32 0.17677669, %v1804_v54 }
0x10d9   :  { %v1813_v55 = vsel %vm1812_vm12, %v1807_v37, -1e+30 }
0x10da   :  { %v1814_v39 = vsel %vm896_vm0, %v1813_v55, -inf }
0x10db   :  { %1815 = vmax.xlane.f32.xlu2 %v1814_v39 }
0x1142   :  { %v1734_v56 = vpop.xlane.xlu2 %1733 }
0x1143   :  { %v1735_v41 = vsub.f32 %v1731_v52, %v1734_v56 }
0x1145   :  { %v1736_v57 = vmul.f32 1.442695, %v1735_v41 }
0x1147   :  { %2197 = vpow2.f32 %v1736_v57 }
0x114d   :  { %v2198_v28 = vpop.eup %2197 }
0x114e   :  { %v1816_v58 = vpop.xlane.xlu2 %1815  ;;  %v1738_v59 = vsel %vm896_vm0, %v2198_v28, 0.0 }
0x114f   :  { %v1817_v5 = vsub.f32 %v1813_v55, %v1816_v58  ;;  %1739 = vadd.xlane.f32.xlu0 %v1738_v59 }
0x1151   :  { %v1818_v42 = vmul.f32 1.442695, %v1817_v5 }
0x1153   :  { %2199 = vpow2.f32 %v1818_v42 }
0x1159   :  { %v2200_v8 = vpop.eup %2199 }
0x115a   :  { %v1820_v44 = vsel %vm896_vm0, %v2200_v8, 0.0 }
0x115b   :  { %1821 = vadd.xlane.f32.xlu2 %v1820_v44 }
0x11c2   :  { %v1740_v17 = vpop.xlane.xlu0 %1739 }
0x11c3   :  { %2201 = vrcp.f32 %v1740_v17 }
0x11c9   :  { %v2202_v21 = vpop.eup %2201 }
0x11ca   :  { %v1742_v61 = vmul.f32 %v2202_v21, %v2198_v28 }
0x11cc   :  { %2106 = vmatmul.msk.f32.vlgmr.msrb.gmra.mxu1 %vm896_vm0, %v1742_v61 }
0x11ce   :  { %v1822_v11 = vpop.xlane.xlu2 %1821 }
0x11cf   :  { %2203 = vrcp.f32 %v1822_v11 }
0x11d5   :  { %v2204_v12 = vpop.eup %2203 }
0x11d6   :  { %v1824_v62 = vmul.f32 %v2204_v12, %v2200_v8 }
0x11d8   :  { %2109 = vmatmul.msk.f32.vlgmr.msra.gmra.mxu1 %vm896_vm0, %v1824_v62 }
0x1249   :  { %v1763_v13 = vpop.f32.mrf.mxu1 }
0x124a   :  { %2110 = vmatmul.msk.f32.vlgmr.msra.gmra.mxu2 %vm268_vm2, %v1763_v13 }
0x1255   :  { %v1845_v9 = vpop.f32.mrf.mxu1 }
0x1256   :  { %2111 = vmatmul.msk.f32.gmra.mxu2 %vm268_vm2, %v1845_v9 }
0x12cd   :  { %v1871_v10 = vpop.f32.mrf.mxu2 }
0x12ce   :  { %v1872_v25 = vadd.f32 %v1871_v10, %v2734_v32 }
0x12d0   :  { %v1877_v14 = vadd.f32 %v2732_v29, %v1872_v25 }
0x12d2   :  { %v2112_v22 = vmul.f32 -1.442695, %v1877_v14 }
0x12d4   :  { %2205 = vpow2.f32 %v2112_v22 }
0x12d9   :  { %v1874_v60 = vpop.f32.mrf.mxu2 }
0x12da   :  { %v2206_v24 = vpop.eup %2205  ;;  %v1875_v35 = vadd.f32 %v1874_v60, %v2766_v31 }
0x12db   :  { %v1885_v33 = vadd.f32 1.0, %v2206_v24 }
0x12dc   :  { %v1878_v36 = vadd.f32 %v2732_v29, %v1875_v35 }
0x12dd   :  { %2207 = vrcp.f32 %v1885_v33  ;;  %v1898_v38 = vand.u32 2147483648, %v1885_v33  ;;  %v1896_v0 = vand.u32 2147483647, %v1885_v33  ;;  %vm1892_vm0 = vweird.f32 %v1885_v33 }
0x12de   :  { %v2113_v4 = vmul.f32 -1.442695, %v1878_v36 }
0x12df   :  { %v1899_v31 = vor.u32 1.1754944e-38, %v1898_v38  ;;  %vm1897_vm14 = vcmp.eq.f32.partialorder %v1896_v0, 8.507059e+37 }
0x12e0   :  { %2209 = vpow2.f32 %v2113_v4 }
0x12e3   :  { %v2208_v7 = vpop.eup %2207 }
0x12e4   :  { %v1888_v16 = vmul.f32 %v2208_v7, %v1885_v33  ;;  %vm1893_vm15 = vweird.f32 %v2208_v7 }
0x12e5   :  { %vm1894_vm13 = vmor %vm1892_vm0, %vm1893_vm15 }
0x12e6   :  { %v2210_v19 = vpop.eup %2209  ;;  %v1889_v63 = vsub.f32 1.0, %v1888_v16 }
0x12e7   :  { %v1886_v32 = vadd.f32 1.0, %v2210_v19 }
0x12e8   :  { %v1890_v26 = vmul.f32 %v2208_v7, %v1889_v63 }
0x12e9   :  { %2211 = vrcp.f32 %v1886_v32  ;;  %v1913_v27 = vand.u32 2147483648, %v1886_v32  ;;  %v1911_v47 = vand.u32 2147483647, %v1886_v32  ;;  %vm1907_vm3 = vweird.f32 %v1886_v32 }
0x12ea   :  { %v1891_v1 = vadd.f32 %v2208_v7, %v1890_v26 }
0x12eb   :  { %v1914_v48 = vor.u32 1.1754944e-38, %v1913_v27  ;;  %vm1912_vm6 = vcmp.eq.f32.partialorder %v1911_v47, 8.507059e+37 }
0x12ec   :  { %v1895_v2 = vsel %vm1894_vm13, %v2208_v7, %v1891_v1 }
0x12ed   :  { %v1900_v29 = vsel %vm1897_vm14, %v1899_v31, %v1895_v2 }
0x12ee   :  { %v1919_v3 = vsub.f32 1.0, %v1900_v29  ;;  %v1917_v18 = vmul.f32 %v1900_v29, %v2503_v20 }
0x12ef   :  { %v2212_v6 = vpop.eup %2211 }
0x12f0   :  { %v1903_v15 = vmul.f32 %v2212_v6, %v1886_v32  ;;  %v1921_v40 = vmul.f32 %v1919_v3, %v1763_v13  ;;  %vm1908_vm1 = vweird.f32 %v2212_v6 }
0x12f1   :  { %vm1909_vm5 = vmor %vm1907_vm3, %vm1908_vm1 }
0x12f2   :  { %v1904_v43 = vsub.f32 1.0, %v1903_v15  ;;  %v1923_v45 = vadd.f32 %v1921_v40, %v1917_v18 }
0x12f4   :  { %2114 = vmatmul.msk.f32.vlgmr.msrb.gmra.mxu3 %vm268_vm2, %v1923_v45  ;;  %v1905_v46 = vmul.f32 %v2212_v6, %v1904_v43 }
0x12f6   :  { %v1906_v30 = vadd.f32 %v2212_v6, %v1905_v46 }
0x12f8   :  { %v1910_v49 = vsel %vm1909_vm5, %v2212_v6, %v1906_v30 }
0x12f9   :  { %v1915_v50 = vsel %vm1912_vm6, %v1914_v48, %v1910_v49 }
0x12fa   :  { %v1920_v52 = vsub.f32 1.0, %v1915_v50  ;;  %v1918_v34 = vmul.f32 %v1915_v50, %v2507_v23 }
0x12fc   :  { %v1922_v20 = vmul.f32 %v1920_v52, %v1845_v9 }
0x12fe   :  { %v1924_v53 = vadd.f32 %v1922_v20, %v1918_v34 }
0x1300   :  { %2115 = vmatmul.msk.f32.gmra.mxu3 %vm268_vm2, %v1924_v53 }
0x1377   :  { %v1948_v23 = vpop.f32.mrf.mxu3 }
0x1378   :  { %v1949_v54 = vadd.f32 %v2782_v51, %v1948_v23 }
0x137a   :  { %1954 = vst.msk [vmem:[%s2940_s20] sm:$0xff] %vm268_vm2, %v1949_v54 }
0x1383   :  { %v1951_v37 = vpop.f32.mrf.mxu3 }
0x1384   :  { %v1952_v55 = vadd.f32 %v2782_v51, %v1951_v37 }
0x1386   :  { %1955 = vst.msk [vmem:[%s2940_s20 + $0x8] sm:$0xff] %vm268_vm2, %v1952_v55 }
0x1387   :  { %2261 = dma.done.wait [#allocation3], 256  }
0x1388   :  { %2262 = vsyncadd [#allocation3], 4294967040 }
0x1389   :  { %2263 = dma.done.wait [#allocation5], 512  }
0x138a   :  { %2264 = vsyncadd [#allocation5], 4294966784 }
0x138b   :  { %1994 = vsyncpa [#allocation3], 1 }
0x138c   :  { %1995 = vsyncpa [#allocation5], 1 }

</bundles_post_ra>
